<compile_context>
chip_gen: v6e
topology: v6e:2x2x1
jax: 0.10.0
libtpu: 0.0.40
codegen_flags: <defaults>
</compile_context>

<pallas_src>
import functools
import math

import jax
import jax.numpy as jnp
from jax import lax
from jax.experimental import pallas as pl
from jax.experimental.pallas import tpu as pltpu


# --------------------- generation-aware sizing ------------------------------

def _vmem_capacity_bytes():
    try:
        return int(pltpu.get_tpu_info().vmem_capacity_bytes)
    except Exception:
        return 64 * 1024 * 1024          # conservative (v7x-sized) fallback


_VMEM_CAP = _vmem_capacity_bytes()
_SMALL_VMEM = _VMEM_CAP <= 64 * 1024 * 1024          # v7x-class TensorCore
_VMEM_LIMIT = max(32 * 1024 * 1024,
                  min((_VMEM_CAP * 3) // 4, 96 * 1024 * 1024))

if _SMALL_VMEM:                          # v7x: 64 MiB physical VMEM
    _TM_PREFS = (256, 128)
    _TN_PREFS = (256, 128)
    _TK_PREFS = (512, 256, 128)
    _FFN_TM_PREFS = (128,)
    _TFF_PREFS = (256, 128)
else:                                    # v5e / v6e: 128 MiB physical VMEM
    _TM_PREFS = (512, 256, 128)
    _TN_PREFS = (512, 256, 128)
    _TK_PREFS = (1024, 512, 256, 128)
    _FFN_TM_PREFS = (256, 128)
    _TFF_PREFS = (512, 256, 128)


def _pick_tile(dim, prefs):
    """Largest preferred tile that divides `dim`; otherwise the full dim."""
    for t in prefs:
        if dim >= t and dim % t == 0:
            return t
    return dim


def _choose_tm(m, prefs):
    """Row-tile and (possibly padded) row count so the grid always divides."""
    for t in prefs:
        if m >= t and m % t == 0:
            return t, m
    if m > prefs[-1]:
        t = prefs[-1]
        return t, ((m + t - 1) // t) * t
    return m, m


def _pad_rows(a, m_pad):
    m = a.shape[0]
    if m == m_pad:
        return a
    return jnp.pad(a, ((0, m_pad - m), (0, 0)))


# --------------------------- projection kernel -------------------------------

def _matmul_bias_kernel(x_ref, w_ref, b_ref, o_ref, acc_ref):
    # grid = (M tiles, N tiles, K tiles); K is the reduction axis.
    @pl.when(pl.program_id(2) == 0)
    def _():
        acc_ref[...] = jnp.zeros_like(acc_ref)

    acc_ref[...] += jnp.dot(x_ref[...].astype(jnp.bfloat16), w_ref[...],
                            preferred_element_type=jnp.float32)

    @pl.when(pl.program_id(2) == pl.num_programs(2) - 1)
    def _():
        o_ref[...] = (acc_ref[...] + b_ref[...]).astype(o_ref.dtype)


def matmul_bias(x2d, w, b, out_dtype=jnp.bfloat16):
    """y = x @ w + b.  Weights pre-cast bf16; tiled over (M, N, K)."""
    M, K = x2d.shape
    N = w.shape[1]
    tm, m_pad = _choose_tm(M, _TM_PREFS)
    tn = _pick_tile(N, _TN_PREFS)
    tk = _pick_tile(K, _TK_PREFS)
    out = pl.pallas_call(
        _matmul_bias_kernel,
        out_shape=jax.ShapeDtypeStruct((m_pad, N), out_dtype),
        grid=(m_pad // tm, N // tn, K // tk),
        in_specs=[
            pl.BlockSpec((tm, tk), lambda i, j, k: (i, k)),
            pl.BlockSpec((tk, tn), lambda i, j, k: (k, j)),
            pl.BlockSpec((1, tn), lambda i, j, k: (0, j)),
        ],
        out_specs=pl.BlockSpec((tm, tn), lambda i, j, k: (i, j)),
        scratch_shapes=[pltpu.VMEM((tm, tn), jnp.float32)],
        compiler_params=pltpu.CompilerParams(
            dimension_semantics=("parallel", "parallel", "arbitrary"),
            vmem_limit_bytes=_VMEM_LIMIT,
        ),
    )(_pad_rows(x2d, m_pad), w, b)
    return out if m_pad == M else out[:M]


# ----------------- out-proj + residual + LayerNorm (fused) -------------------

def _proj_add_ln_kernel(c_ref, w_ref, b_ref, r_ref, g_ref, be_ref, o_ref,
                        acc_ref):
    # grid = (M tiles, K tiles); K (= d_model of the attention output) reduces.
    @pl.when(pl.program_id(1) == 0)
    def _():
        acc_ref[...] = jnp.zeros_like(acc_ref)

    acc_ref[...] += jnp.dot(c_ref[...].astype(jnp.bfloat16), w_ref[...],
                            preferred_element_type=jnp.float32)

    @pl.when(pl.program_id(1) == pl.num_programs(1) - 1)
    def _():
        h = r_ref[...] + acc_ref[...] + b_ref[...]
        mu = jnp.mean(h, axis=-1, keepdims=True)
        var = jnp.mean((h - mu) ** 2, axis=-1, keepdims=True)
        o_ref[...] = (h - mu) * lax.rsqrt(var + 1e-5) * g_ref[...] + be_ref[...]


def proj_add_layernorm(c2d, w, b, r2d, gamma, beta):
    M, K = c2d.shape
    N = w.shape[1]
    tm, m_pad = _choose_tm(M, _TM_PREFS)
    tk = _pick_tile(K, _TK_PREFS)
    out = pl.pallas_call(
        _proj_add_ln_kernel,
        out_shape=jax.ShapeDtypeStruct((m_pad, N), jnp.float32),
        grid=(m_pad // tm, K // tk),
        in_specs=[
            pl.BlockSpec((tm, tk), lambda i, k: (i, k)),
            pl.BlockSpec((tk, N), lambda i, k: (k, 0)),
            pl.BlockSpec((1, N), lambda i, k: (0, 0)),
            pl.BlockSpec((tm, N), lambda i, k: (i, 0)),
            pl.BlockSpec((1, N), lambda i, k: (0, 0)),
            pl.BlockSpec((1, N), lambda i, k: (0, 0)),
        ],
        out_specs=pl.BlockSpec((tm, N), lambda i, k: (i, 0)),
        scratch_shapes=[pltpu.VMEM((tm, N), jnp.float32)],
        compiler_params=pltpu.CompilerParams(
            dimension_semantics=("parallel", "arbitrary"),
            vmem_limit_bytes=_VMEM_LIMIT,
        ),
    )(_pad_rows(c2d, m_pad), w, b, _pad_rows(r2d, m_pad), gamma, beta)
    return out if m_pad == M else out[:M]


# --------------- FFN (fc1 -> tanh -> fc2) + residual + LayerNorm -------------

def _ffn_add_ln_kernel(x_ref, w1_ref, b1_ref, w2_ref, b2_ref, g_ref, be_ref,
                       o_ref, acc_ref):
    # grid = (M tiles, d_ff tiles); d_ff is the reduction axis of fc2.
    j = pl.program_id(1)

    @pl.when(j == 0)
    def _():
        acc_ref[...] = jnp.zeros_like(acc_ref)

    h = jnp.tanh(
        jnp.dot(x_ref[...].astype(jnp.bfloat16), w1_ref[...],
                preferred_element_type=jnp.float32) + b1_ref[...]
    )
    acc_ref[...] += jnp.dot(h.astype(jnp.bfloat16), w2_ref[...],
                            preferred_element_type=jnp.float32)

    @pl.when(j == pl.num_programs(1) - 1)
    def _():
        hres = x_ref[...] + acc_ref[...] + b2_ref[...]     # residual add (f32)
        mu = jnp.mean(hres, axis=-1, keepdims=True)
        var = jnp.mean((hres - mu) ** 2, axis=-1, keepdims=True)
        o_ref[...] = (hres - mu) * lax.rsqrt(var + 1e-5) * g_ref[...] + be_ref[...]


def ffn_add_layernorm(x2d, w1, b1, w2, b2, gamma, beta):
    M, D = x2d.shape
    Dff = w1.shape[1]
    tm, m_pad = _choose_tm(M, _FFN_TM_PREFS)
    tff = _pick_tile(Dff, _TFF_PREFS)
    out = pl.pallas_call(
        _ffn_add_ln_kernel,
        out_shape=jax.ShapeDtypeStruct((m_pad, D), jnp.float32),
        grid=(m_pad // tm, Dff // tff),
        in_specs=[
            pl.BlockSpec((tm, D), lambda i, j: (i, 0)),
            # TODO(synk): sweep pipeline_mode=pl.Buffered(3) for w1/w2 on v7x if
            # the bundle dump shows exposed weight DMA at the smaller tiles.
            pl.BlockSpec((D, tff), lambda i, j: (0, j)),
            pl.BlockSpec((1, tff), lambda i, j: (0, j)),
            pl.BlockSpec((tff, D), lambda i, j: (j, 0)),
            pl.BlockSpec((1, D), lambda i, j: (0, 0)),
            pl.BlockSpec((1, D), lambda i, j: (0, 0)),
            pl.BlockSpec((1, D), lambda i, j: (0, 0)),
        ],
        out_specs=pl.BlockSpec((tm, D), lambda i, j: (i, 0)),
        scratch_shapes=[pltpu.VMEM((tm, D), jnp.float32)],
        compiler_params=pltpu.CompilerParams(
            dimension_semantics=("parallel", "arbitrary"),
            vmem_limit_bytes=_VMEM_LIMIT,
        ),
    )(_pad_rows(x2d, m_pad), w1, b1, w2, b2, gamma, beta)
    return out if m_pad == M else out[:M]


# ------------------------------- attention -----------------------------------

def _attn_head_kernel(q_ref, k_ref, v_ref, o_ref, *, scale):
    # One (batch, head) block per grid step; all blocks lane-dense (d_k % 128 == 0).
    q = q_ref[0]                                      # (Sq, d_k) bf16
    k = k_ref[0]                                      # (Sk, d_k) bf16
    v = v_ref[0]                                      # (Sk, d_k) bf16
    # q @ k^T by contracting last axes directly (no materialized transpose).
    s = lax.dot_general(q, k, (((1,), (1,)), ((), ())),
                        preferred_element_type=jnp.float32) * scale
    s = s - jnp.max(s, axis=-1, keepdims=True)
    e = jnp.exp(s)
    p = e * pl.reciprocal(jnp.sum(e, axis=-1, keepdims=True), approx=True)
    o = jnp.dot(p.astype(v.dtype), v, preferred_element_type=jnp.float32)
    o_ref[0, 0] = o.astype(o_ref.dtype)               # single dense store


def _attn_fallback_kernel(q_ref, kv_ref, o_ref, *, num_heads, d_k, scale,
                          q_off, k_off, v_off):
    # Fallback for d_k not a multiple of 128: full-row blocks, per-head loop.
    qrow = q_ref[0]
    kvrow = kv_ref[0]
    for h in range(num_heads):                        # static unroll
        qh = qrow[:, q_off + h * d_k:q_off + (h + 1) * d_k]
        kh = kvrow[:, k_off + h * d_k:k_off + (h + 1) * d_k]
        vh = kvrow[:, v_off + h * d_k:v_off + (h + 1) * d_k]
        s = lax.dot_general(qh, kh, (((1,), (1,)), ((), ())),
                            preferred_element_type=jnp.float32) * scale
        s = s - jnp.max(s, axis=-1, keepdims=True)
        e = jnp.exp(s)
        p = e * pl.reciprocal(jnp.sum(e, axis=-1, keepdims=True), approx=True)
        o = jnp.dot(p.astype(vh.dtype), vh, preferred_element_type=jnp.float32)
        o_ref[0, h] = o.astype(o_ref.dtype)


def _mha_core(q_arr, kv_arr, d_model, num_heads, q_off, k_off, v_off):
    """Scaled-dot-product attention.  q_arr holds the Q columns starting at
    q_off; kv_arr holds K columns at k_off and V columns at v_off (so fused
    QKV / KV projections are consumed without any XLA-level column slices)."""
    B, Sq, _ = q_arr.shape
    Sk = kv_arr.shape[1]
    H = num_heads
    d_k = d_model // H
    scale = 1.0 / math.sqrt(d_k)
    out_shape = jax.ShapeDtypeStruct((B, H, Sq, d_k), jnp.bfloat16)

    # TODO(synk): for long sequences, tile over Sk with flash-style online softmax.
    if d_k % 128 == 0:
        # Lane-dense head-blocked path: BlockSpec index_maps do the q/k/v and
        # per-head column split (DMA level) -> no sub-128-lane in-kernel slices,
        # one dense store per grid step, heads are a parallel grid axis.
        qb, kb, vb = q_off // d_k, k_off // d_k, v_off // d_k
        kern = functools.partial(_attn_head_kernel, scale=scale)
        return pl.pallas_call(
            kern,
            out_shape=out_shape,
            grid=(B, H),
            in_specs=[
                pl.BlockSpec((1, Sq, d_k), lambda b, h: (b, 0, qb + h)),
                pl.BlockSpec((1, Sk, d_k), lambda b, h: (b, 0, kb + h)),
                pl.BlockSpec((1, Sk, d_k), lambda b, h: (b, 0, vb + h)),
            ],
            out_specs=pl.BlockSpec((1, 1, Sq, d_k), lambda b, h: (b, h, 0, 0)),
            compiler_params=pltpu.CompilerParams(
                dimension_semantics=("parallel", "parallel"),
                vmem_limit_bytes=_VMEM_LIMIT,
            ),
        )(q_arr, kv_arr, kv_arr)

    kern = functools.partial(_attn_fallback_kernel, num_heads=H, d_k=d_k,
                             scale=scale, q_off=q_off, k_off=k_off, v_off=v_off)
    return pl.pallas_call(
        kern,
        out_shape=out_shape,
        grid=(B,),
        in_specs=[
            pl.BlockSpec((1, Sq, q_arr.shape[2]), lambda b: (b, 0, 0)),
            pl.BlockSpec((1, Sk, kv_arr.shape[2]), lambda b: (b, 0, 0)),
        ],
        out_specs=pl.BlockSpec((1, H, Sq, d_k), lambda b: (b, 0, 0, 0)),
        compiler_params=pltpu.CompilerParams(
            dimension_semantics=("parallel",),
            vmem_limit_bytes=_VMEM_LIMIT,
        ),
    )(q_arr, kv_arr)


# ----------------------------- layer wrapper ---------------------------------

def decoder_layer_forward(x, enc_output, p, num_heads):
    B, S, D = x.shape
    Se = enc_output.shape[1]
    assert D % num_heads == 0
    x2d = x.reshape(B * S, D)
    enc2d = enc_output.reshape(B * Se, D)

    # ----- self-attention block (dropout = identity, eval mode) -----
    qkv = matmul_bias(x2d, p["sa_wqkv"], p["sa_bqkv"])          # (B*S, 3D) bf16
    attn = _mha_core(qkv.reshape(B, S, 3 * D), qkv.reshape(B, S, 3 * D),
                     D, num_heads, 0, D, 2 * D)                 # (B, H, S, d_k)
    # combine_heads exactly as in the reference: raw view, NO head transpose.
    combined = attn.reshape(B * S, D)
    x2d = proj_add_layernorm(combined, p["sa_wo"], p["sa_bo"], x2d,
                             p["g1"], p["b1"])                  # W_o + res + LN1

    # ----- cross-attention block -----
    q = matmul_bias(x2d, p["ca_wq"], p["ca_bq"]).reshape(B, S, D)
    kv = matmul_bias(enc2d, p["ca_wkv"], p["ca_bkv"]).reshape(B, Se, 2 * D)
    attn = _mha_core(q, kv, D, num_heads, 0, 0, D)
    combined = attn.reshape(B * S, D)
    x2d = proj_add_layernorm(combined, p["ca_wo"], p["ca_bo"], x2d,
                             p["g2"], p["b2"])                  # W_o + res + LN2

    # ----- position-wise FF (fc1 -> tanh -> fc2) + residual + LN3 -----
    x2d = ffn_add_layernorm(x2d, p["w1"], p["bf1"], p["w2"], p["bf2"],
                            p["g3"], p["b3"])
    return x2d.reshape(B, S, D)


# ------------------------------- params ---------------------------------------

def prepare_params(params):
    """One-time weight prep: fuse QKV / KV and cast matmul weights to bf16."""
    sa, ca = params["self_attn"], params["cross_attn"]
    f32 = jnp.float32
    bf16 = jnp.bfloat16
    return {
        "sa_wqkv": jnp.concatenate([sa["wq"], sa["wk"], sa["wv"]], 1).astype(bf16),
        "sa_bqkv": jnp.concatenate([sa["bq"], sa["bk"], sa["bv"]]).astype(f32).reshape(1, -1),
        "sa_wo": sa["wo"].astype(bf16),
        "sa_bo": sa["bo"].astype(f32).reshape(1, -1),
        "ca_wq": ca["wq"].astype(bf16),
        "ca_bq": ca["bq"].astype(f32).reshape(1, -1),
        "ca_wkv": jnp.concatenate([ca["wk"], ca["wv"]], 1).astype(bf16),
        "ca_bkv": jnp.concatenate([ca["bk"], ca["bv"]]).astype(f32).reshape(1, -1),
        "ca_wo": ca["wo"].astype(bf16),
        "ca_bo": ca["bo"].astype(f32).reshape(1, -1),
        "w1": params["w1"].astype(bf16),
        "bf1": params["bf1"].astype(f32).reshape(1, -1),
        "w2": params["w2"].astype(bf16),
        "bf2": params["bf2"].astype(f32).reshape(1, -1),
        "g1": params["g1"].astype(f32).reshape(1, -1),
        "b1": params["b1"].astype(f32).reshape(1, -1),
        "g2": params["g2"].astype(f32).reshape(1, -1),
        "b2": params["b2"].astype(f32).reshape(1, -1),
        "g3": params["g3"].astype(f32).reshape(1, -1),
        "b3": params["b3"].astype(f32).reshape(1, -1),
    }


def init_params(key, d_model, d_ff):
    keys = jax.random.split(key, 24)
    s = 0.05

    def attn_params(ks):
        return {
            "wq": jax.random.normal(ks[0], (d_model, d_model), jnp.float32) * s,
            "bq": jax.random.normal(ks[1], (d_model,), jnp.float32) * s,
            "wk": jax.random.normal(ks[2], (d_model, d_model), jnp.float32) * s,
            "bk": jax.random.normal(ks[3], (d_model,), jnp.float32) * s,
            "wv": jax.random.normal(ks[4], (d_model, d_model), jnp.float32) * s,
            "bv": jax.random.normal(ks[5], (d_model,), jnp.float32) * s,
            "wo": jax.random.normal(ks[6], (d_model, d_model), jnp.float32) * s,
            "bo": jax.random.normal(ks[7], (d_model,), jnp.float32) * s,
        }

    return {
        "self_attn": attn_params(keys[0:8]),
        "cross_attn": attn_params(keys[8:16]),
        "w1": jax.random.normal(keys[16], (d_model, d_ff), jnp.float32) * s,
        "bf1": jax.random.normal(keys[17], (d_ff,), jnp.float32) * s,
        "w2": jax.random.normal(keys[18], (d_ff, d_model), jnp.float32) * s,
        "bf2": jax.random.normal(keys[19], (d_model,), jnp.float32) * s,
        # LayerNorm affine params (PyTorch default init: gamma=1, beta=0)
        "g1": jnp.ones((d_model,), jnp.float32),
        "b1": jnp.zeros((d_model,), jnp.float32),
        "g2": jnp.ones((d_model,), jnp.float32),
        "b2": jnp.zeros((d_model,), jnp.float32),
        "g3": jnp.ones((d_model,), jnp.float32),
        "b3": jnp.zeros((d_model,), jnp.float32),
    }


# -------------------------------- main -----------------------------------------

if __name__ == "__main__":
    B, S, Se = 2, 8, 8           # batch, target seq, encoder seq
    D, H, Dff = 256, 2, 512      # d_model, num_heads (d_k = 128), d_ff

    key = jax.random.PRNGKey(0)
    kx, kenc, kp = jax.random.split(key, 3)

    x = jax.random.normal(kx, (B, S, D), jnp.float32)
    enc_output = jax.random.normal(kenc, (B, Se, D), jnp.float32)
    params = init_params(kp, D, Dff)
    prepped = prepare_params(params)     # one-time weight concat + bf16 cast

    fwd = jax.jit(functools.partial(decoder_layer_forward, num_heads=H))
    out = fwd(x, enc_output, prepped)
    out = jax.block_until_ready(out)
    assert out.shape == (B, S, D)
    assert bool(jnp.all(jnp.isfinite(out)))
    print("KERNEL_OK")
</pallas_src>

<mosaic_0001>
module attributes {stable_mosaic.version = 11 : i64} {
  func.func @_attn_head_kernel(%arg0: i32, %arg1: i32, %arg2: memref<1x8x128xbf16, #tpu.memory_space<vmem>>, %arg3: memref<1x8x128xbf16, #tpu.memory_space<vmem>>, %arg4: memref<1x8x128xbf16, #tpu.memory_space<vmem>>, %arg5: memref<1x1x8x128xbf16, #tpu.memory_space<vmem>>) attributes {dimension_semantics = [#tpu.dimension_semantics<parallel>, #tpu.dimension_semantics<parallel>], iteration_bounds = array<i64: 2, 2>, scalar_prefetch = 0 : i64, scratch_operands = 0 : i64, tpu.core_type = #tpu.core_type<tc>, window_params = [{transform_indices = @transform_0, window_bounds = array<i64: 1, 8, 128>}, {transform_indices = @transform_1, window_bounds = array<i64: 1, 8, 128>}, {transform_indices = @transform_2, window_bounds = array<i64: 1, 8, 128>}, {transform_indices = @transform_3, window_bounds = array<i64: 1, 1, 8, 128>}]} {
    %c0 = arith.constant 0 : index
    %c0_0 = arith.constant 0 : index
    %c0_1 = arith.constant 0 : index
    %0 = vector.load %arg2[%c0, %c0_0, %c0_1] : memref<1x8x128xbf16, #tpu.memory_space<vmem>>, vector<1x8x128xbf16>
    %1 = vector.shape_cast %0 : vector<1x8x128xbf16> to vector<8x128xbf16>
    %c0_2 = arith.constant 0 : index
    %c0_3 = arith.constant 0 : index
    %c0_4 = arith.constant 0 : index
    %2 = vector.load %arg3[%c0_2, %c0_3, %c0_4] : memref<1x8x128xbf16, #tpu.memory_space<vmem>>, vector<1x8x128xbf16>
    %3 = vector.shape_cast %2 : vector<1x8x128xbf16> to vector<8x128xbf16>
    %c0_5 = arith.constant 0 : index
    %c0_6 = arith.constant 0 : index
    %c0_7 = arith.constant 0 : index
    %4 = vector.load %arg4[%c0_5, %c0_6, %c0_7] : memref<1x8x128xbf16, #tpu.memory_space<vmem>>, vector<1x8x128xbf16>
    %5 = vector.shape_cast %4 : vector<1x8x128xbf16> to vector<8x128xbf16>
    %cst = arith.constant dense<0.000000e+00> : vector<8x8xf32>
    %6 = tpu.matmul %1, %3, %cst {dimension_numbers = #tpu.dot_dimension_numbers<[1], [1], [0], [0], [0, 0, 1, 0], [], []>} : vector<8x128xbf16>, vector<8x128xbf16>, vector<8x8xf32> -> vector<8x8xf32>
    %cst_8 = arith.constant 0.0883883461 : f32
    %7 = vector.broadcast %cst_8 : f32 to vector<8x8xf32>
    %8 = arith.mulf %6, %7 : vector<8x8xf32>
    %cst_9 = arith.constant dense<0xFF800000> : vector<8xf32>
    %9 = vector.multi_reduction <maximumf>, %8, %cst_9 [1] : vector<8x8xf32> to vector<8xf32>
    %10 = vector.shape_cast %9 : vector<8xf32> to vector<8x1xf32>
    %11 = vector.broadcast %10 : vector<8x1xf32> to vector<8x8xf32>
    %12 = arith.subf %8, %11 : vector<8x8xf32>
    %13 = math.exp %12 : vector<8x8xf32>
    %cst_10 = arith.constant dense<0.000000e+00> : vector<8xf32>
    %14 = vector.multi_reduction <add>, %13, %cst_10 [1] : vector<8x8xf32> to vector<8xf32>
    %15 = vector.shape_cast %14 : vector<8xf32> to vector<8x1xf32>
    %16 = tpu.reciprocal %15 {approx = true} : vector<8x1xf32> -> vector<8x1xf32>
    %17 = vector.broadcast %16 : vector<8x1xf32> to vector<8x8xf32>
    %18 = arith.mulf %13, %17 : vector<8x8xf32>
    %19 = arith.truncf %18 : vector<8x8xf32> to vector<8x8xbf16>
    %cst_11 = arith.constant dense<0.000000e+00> : vector<8x128xf32>
    %20 = tpu.matmul %19, %5, %cst_11 {dimension_numbers = #tpu.dot_dimension_numbers<[1], [0], [0], [1], [0, 0, 1, 1], [], []>} : vector<8x8xbf16>, vector<8x128xbf16>, vector<8x128xf32> -> vector<8x128xf32>
    %21 = arith.truncf %20 : vector<8x128xf32> to vector<8x128xbf16>
    %c0_12 = arith.constant 0 : index
    %c0_13 = arith.constant 0 : index
    %c0_14 = arith.constant 0 : index
    %c0_15 = arith.constant 0 : index
    %22 = vector.load %arg5[%c0_12, %c0_13, %c0_14, %c0_15] : memref<1x1x8x128xbf16, #tpu.memory_space<vmem>>, vector<1x1x8x128xbf16>
    %23 = vector.shape_cast %22 : vector<1x1x8x128xbf16> to vector<8x128xbf16>
    %24 = vector.shape_cast %21 : vector<8x128xbf16> to vector<1x1x8x128xbf16>
    tpu.vector_store %arg5[%c0_12, %c0_13, %c0_14, %c0_15], %24 {strides = array<i32>} : memref<1x1x8x128xbf16, #tpu.memory_space<vmem>>, vector<1x1x8x128xbf16>,
    return
  }
  func.func @transform_0(%arg0: i32, %arg1: i32) -> (i32, i32, i32) {
    %c0_i32 = arith.constant 0 : i32
    %0 = arith.addi %c0_i32, %arg1 : i32
    %c0_i32_0 = arith.constant 0 : i32
    %c0_i32_1 = arith.constant 0 : i32
    return %arg0, %c0_i32_0, %0 : i32, i32, i32
  }
  func.func @transform_1(%arg0: i32, %arg1: i32) -> (i32, i32, i32) {
    %c2_i32 = arith.constant 2 : i32
    %0 = arith.addi %c2_i32, %arg1 : i32
    %c0_i32 = arith.constant 0 : i32
    %c0_i32_0 = arith.constant 0 : i32
    return %arg0, %c0_i32, %0 : i32, i32, i32
  }
  func.func @transform_2(%arg0: i32, %arg1: i32) -> (i32, i32, i32) {
    %c4_i32 = arith.constant 4 : i32
    %0 = arith.addi %c4_i32, %arg1 : i32
    %c0_i32 = arith.constant 0 : i32
    %c0_i32_0 = arith.constant 0 : i32
    return %arg0, %c0_i32, %0 : i32, i32, i32
  }
  func.func @transform_3(%arg0: i32, %arg1: i32) -> (i32, i32, i32, i32) {
    %c0_i32 = arith.constant 0 : i32
    %c0_i32_0 = arith.constant 0 : i32
    %c0_i32_1 = arith.constant 0 : i32
    return %arg0, %arg1, %c0_i32, %c0_i32_0 : i32, i32, i32, i32
  }
}

module attributes {stable_mosaic.version = 11 : i64} {
  func.func @_matmul_bias_kernel(%arg0: i32, %arg1: i32, %arg2: i32, %arg3: memref<16x256xf32, #tpu.memory_space<vmem>>, %arg4: memref<256x256xbf16, #tpu.memory_space<vmem>>, %arg5: memref<1x256xf32, #tpu.memory_space<vmem>>, %arg6: memref<16x256xbf16, #tpu.memory_space<vmem>>, %arg7: memref<16x256xf32, #tpu.memory_space<vmem>>) attributes {dimension_semantics = [#tpu.dimension_semantics<parallel>, #tpu.dimension_semantics<parallel>, #tpu.dimension_semantics<arbitrary>], iteration_bounds = array<i64: 1, 3, 1>, scalar_prefetch = 0 : i64, scratch_operands = 1 : i64, tpu.core_type = #tpu.core_type<tc>, window_params = [{transform_indices = @transform_0, window_bounds = array<i64: 16, 256>}, {transform_indices = @transform_1, window_bounds = array<i64: 256, 256>}, {transform_indices = @transform_2, window_bounds = array<i64: 1, 256>}, {transform_indices = @transform_3, window_bounds = array<i64: 16, 256>}]} {
    %c0_i32 = arith.constant 0 : i32
    %0 = arith.cmpi eq, %arg2, %c0_i32 : i32
    %1 = arith.extui %0 : i1 to i32
    %c0_i32_0 = arith.constant 0 : i32
    %2 = arith.cmpi ne, %1, %c0_i32_0 : i32
    scf.if %2 {
      %cst_10 = arith.constant 0.000000e+00 : f32
      %13 = vector.broadcast %cst_10 : f32 to vector<16x256xf32>
      %c0_11 = arith.constant 0 : index
      %c0_12 = arith.constant 0 : index
      %14 = vector.load %arg7[%c0_11, %c0_12] : memref<16x256xf32, #tpu.memory_space<vmem>>, vector<16x256xf32>
      tpu.vector_store %arg7[%c0_11, %c0_12], %13 {strides = array<i32>} : memref<16x256xf32, #tpu.memory_space<vmem>>, vector<16x256xf32>,
    } else {
    }
    %c0 = arith.constant 0 : index
    %c0_1 = arith.constant 0 : index
    %3 = vector.load %arg7[%c0, %c0_1] : memref<16x256xf32, #tpu.memory_space<vmem>>, vector<16x256xf32>
    %c0_2 = arith.constant 0 : index
    %c0_3 = arith.constant 0 : index
    %4 = vector.load %arg3[%c0_2, %c0_3] : memref<16x256xf32, #tpu.memory_space<vmem>>, vector<16x256xf32>
    %5 = arith.truncf %4 : vector<16x256xf32> to vector<16x256xbf16>
    %c0_4 = arith.constant 0 : index
    %c0_5 = arith.constant 0 : index
    %6 = vector.load %arg4[%c0_4, %c0_5] : memref<256x256xbf16, #tpu.memory_space<vmem>>, vector<256x256xbf16>
    %cst = arith.constant dense<0.000000e+00> : vector<16x256xf32>
    %7 = tpu.matmul %5, %6, %cst {dimension_numbers = #tpu.dot_dimension_numbers<[1], [0], [0], [1], [0, 0, 1, 1], [], []>} : vector<16x256xbf16>, vector<256x256xbf16>, vector<16x256xf32> -> vector<16x256xf32>
    %8 = arith.addf %3, %7 : vector<16x256xf32>
    %c0_6 = arith.constant 0 : index
    %c0_7 = arith.constant 0 : index
    %9 = vector.load %arg7[%c0_6, %c0_7] : memref<16x256xf32, #tpu.memory_space<vmem>>, vector<16x256xf32>
    tpu.vector_store %arg7[%c0_6, %c0_7], %8 {strides = array<i32>} : memref<16x256xf32, #tpu.memory_space<vmem>>, vector<16x256xf32>,
    %c0_i32_8 = arith.constant 0 : i32
    %10 = arith.cmpi eq, %arg2, %c0_i32_8 : i32
    %11 = arith.extui %10 : i1 to i32
    %c0_i32_9 = arith.constant 0 : i32
    %12 = arith.cmpi ne, %11, %c0_i32_9 : i32
    scf.if %12 {
      %c0_10 = arith.constant 0 : index
      %c0_11 = arith.constant 0 : index
      %13 = vector.load %arg7[%c0_10, %c0_11] : memref<16x256xf32, #tpu.memory_space<vmem>>, vector<16x256xf32>
      %c0_12 = arith.constant 0 : index
      %c0_13 = arith.constant 0 : index
      %14 = vector.load %arg5[%c0_12, %c0_13] : memref<1x256xf32, #tpu.memory_space<vmem>>, vector<1x256xf32>
      %15 = vector.broadcast %14 : vector<1x256xf32> to vector<16x256xf32>
      %16 = arith.addf %13, %15 : vector<16x256xf32>
      %17 = arith.truncf %16 : vector<16x256xf32> to vector<16x256xbf16>
      %c0_14 = arith.constant 0 : index
      %c0_15 = arith.constant 0 : index
      %18 = vector.load %arg6[%c0_14, %c0_15] : memref<16x256xbf16, #tpu.memory_space<vmem>>, vector<16x256xbf16>
      tpu.vector_store %arg6[%c0_14, %c0_15], %17 {strides = array<i32>} : memref<16x256xbf16, #tpu.memory_space<vmem>>, vector<16x256xbf16>,
    } else {
    }
    return
  }
  func.func @transform_0(%arg0: i32, %arg1: i32, %arg2: i32) -> (i32, i32) {
    %c0_i32 = arith.constant 0 : i32
    return %arg0, %arg2 : i32, i32
  }
  func.func @transform_1(%arg0: i32, %arg1: i32, %arg2: i32) -> (i32, i32) {
    %c0_i32 = arith.constant 0 : i32
    return %arg2, %arg1 : i32, i32
  }
  func.func @transform_2(%arg0: i32, %arg1: i32, %arg2: i32) -> (i32, i32) {
    %c0_i32 = arith.constant 0 : i32
    %c0_i32_0 = arith.constant 0 : i32
    return %c0_i32, %arg1 : i32, i32
  }
  func.func @transform_3(%arg0: i32, %arg1: i32, %arg2: i32) -> (i32, i32) {
    %c0_i32 = arith.constant 0 : i32
    return %arg0, %arg1 : i32, i32
  }
}

module attributes {stable_mosaic.version = 11 : i64} {
  func.func @_matmul_bias_kernel(%arg0: i32, %arg1: i32, %arg2: i32, %arg3: memref<16x256xf32, #tpu.memory_space<vmem>>, %arg4: memref<256x256xbf16, #tpu.memory_space<vmem>>, %arg5: memref<1x256xf32, #tpu.memory_space<vmem>>, %arg6: memref<16x256xbf16, #tpu.memory_space<vmem>>, %arg7: memref<16x256xf32, #tpu.memory_space<vmem>>) attributes {dimension_semantics = [#tpu.dimension_semantics<parallel>, #tpu.dimension_semantics<parallel>, #tpu.dimension_semantics<arbitrary>], iteration_bounds = array<i64: 1, 2, 1>, scalar_prefetch = 0 : i64, scratch_operands = 1 : i64, tpu.core_type = #tpu.core_type<tc>, window_params = [{transform_indices = @transform_0, window_bounds = array<i64: 16, 256>}, {transform_indices = @transform_1, window_bounds = array<i64: 256, 256>}, {transform_indices = @transform_2, window_bounds = array<i64: 1, 256>}, {transform_indices = @transform_3, window_bounds = array<i64: 16, 256>}]} {
    %c0_i32 = arith.constant 0 : i32
    %0 = arith.cmpi eq, %arg2, %c0_i32 : i32
    %1 = arith.extui %0 : i1 to i32
    %c0_i32_0 = arith.constant 0 : i32
    %2 = arith.cmpi ne, %1, %c0_i32_0 : i32
    scf.if %2 {
      %cst_10 = arith.constant 0.000000e+00 : f32
      %13 = vector.broadcast %cst_10 : f32 to vector<16x256xf32>
      %c0_11 = arith.constant 0 : index
      %c0_12 = arith.constant 0 : index
      %14 = vector.load %arg7[%c0_11, %c0_12] : memref<16x256xf32, #tpu.memory_space<vmem>>, vector<16x256xf32>
      tpu.vector_store %arg7[%c0_11, %c0_12], %13 {strides = array<i32>} : memref<16x256xf32, #tpu.memory_space<vmem>>, vector<16x256xf32>,
    } else {
    }
    %c0 = arith.constant 0 : index
    %c0_1 = arith.constant 0 : index
    %3 = vector.load %arg7[%c0, %c0_1] : memref<16x256xf32, #tpu.memory_space<vmem>>, vector<16x256xf32>
    %c0_2 = arith.constant 0 : index
    %c0_3 = arith.constant 0 : index
    %4 = vector.load %arg3[%c0_2, %c0_3] : memref<16x256xf32, #tpu.memory_space<vmem>>, vector<16x256xf32>
    %5 = arith.truncf %4 : vector<16x256xf32> to vector<16x256xbf16>
    %c0_4 = arith.constant 0 : index
    %c0_5 = arith.constant 0 : index
    %6 = vector.load %arg4[%c0_4, %c0_5] : memref<256x256xbf16, #tpu.memory_space<vmem>>, vector<256x256xbf16>
    %cst = arith.constant dense<0.000000e+00> : vector<16x256xf32>
    %7 = tpu.matmul %5, %6, %cst {dimension_numbers = #tpu.dot_dimension_numbers<[1], [0], [0], [1], [0, 0, 1, 1], [], []>} : vector<16x256xbf16>, vector<256x256xbf16>, vector<16x256xf32> -> vector<16x256xf32>
    %8 = arith.addf %3, %7 : vector<16x256xf32>
    %c0_6 = arith.constant 0 : index
    %c0_7 = arith.constant 0 : index
    %9 = vector.load %arg7[%c0_6, %c0_7] : memref<16x256xf32, #tpu.memory_space<vmem>>, vector<16x256xf32>
    tpu.vector_store %arg7[%c0_6, %c0_7], %8 {strides = array<i32>} : memref<16x256xf32, #tpu.memory_space<vmem>>, vector<16x256xf32>,
    %c0_i32_8 = arith.constant 0 : i32
    %10 = arith.cmpi eq, %arg2, %c0_i32_8 : i32
    %11 = arith.extui %10 : i1 to i32
    %c0_i32_9 = arith.constant 0 : i32
    %12 = arith.cmpi ne, %11, %c0_i32_9 : i32
    scf.if %12 {
      %c0_10 = arith.constant 0 : index
      %c0_11 = arith.constant 0 : index
      %13 = vector.load %arg7[%c0_10, %c0_11] : memref<16x256xf32, #tpu.memory_space<vmem>>, vector<16x256xf32>
      %c0_12 = arith.constant 0 : index
      %c0_13 = arith.constant 0 : index
      %14 = vector.load %arg5[%c0_12, %c0_13] : memref<1x256xf32, #tpu.memory_space<vmem>>, vector<1x256xf32>
      %15 = vector.broadcast %14 : vector<1x256xf32> to vector<16x256xf32>
      %16 = arith.addf %13, %15 : vector<16x256xf32>
      %17 = arith.truncf %16 : vector<16x256xf32> to vector<16x256xbf16>
      %c0_14 = arith.constant 0 : index
      %c0_15 = arith.constant 0 : index
      %18 = vector.load %arg6[%c0_14, %c0_15] : memref<16x256xbf16, #tpu.memory_space<vmem>>, vector<16x256xbf16>
      tpu.vector_store %arg6[%c0_14, %c0_15], %17 {strides = array<i32>} : memref<16x256xbf16, #tpu.memory_space<vmem>>, vector<16x256xbf16>,
    } else {
    }
    return
  }
  func.func @transform_0(%arg0: i32, %arg1: i32, %arg2: i32) -> (i32, i32) {
    %c0_i32 = arith.constant 0 : i32
    return %arg0, %arg2 : i32, i32
  }
  func.func @transform_1(%arg0: i32, %arg1: i32, %arg2: i32) -> (i32, i32) {
    %c0_i32 = arith.constant 0 : i32
    return %arg2, %arg1 : i32, i32
  }
  func.func @transform_2(%arg0: i32, %arg1: i32, %arg2: i32) -> (i32, i32) {
    %c0_i32 = arith.constant 0 : i32
    %c0_i32_0 = arith.constant 0 : i32
    return %c0_i32, %arg1 : i32, i32
  }
  func.func @transform_3(%arg0: i32, %arg1: i32, %arg2: i32) -> (i32, i32) {
    %c0_i32 = arith.constant 0 : i32
    return %arg0, %arg1 : i32, i32
  }
}

module attributes {stable_mosaic.version = 11 : i64} {
  func.func @_proj_add_ln_kernel(%arg0: i32, %arg1: i32, %arg2: memref<16x256xbf16, #tpu.memory_space<vmem>>, %arg3: memref<256x256xbf16, #tpu.memory_space<vmem>>, %arg4: memref<1x256xf32, #tpu.memory_space<vmem>>, %arg5: memref<16x256xf32, #tpu.memory_space<vmem>>, %arg6: memref<1x256xf32, #tpu.memory_space<vmem>>, %arg7: memref<1x256xf32, #tpu.memory_space<vmem>>, %arg8: memref<16x256xf32, #tpu.memory_space<vmem>>, %arg9: memref<16x256xf32, #tpu.memory_space<vmem>>) attributes {dimension_semantics = [#tpu.dimension_semantics<parallel>, #tpu.dimension_semantics<arbitrary>], iteration_bounds = array<i64: 1, 1>, scalar_prefetch = 0 : i64, scratch_operands = 1 : i64, tpu.core_type = #tpu.core_type<tc>, window_params = [{transform_indices = @transform_0, window_bounds = array<i64: 16, 256>}, {transform_indices = @transform_1, window_bounds = array<i64: 256, 256>}, {pipeline_mode = #tpu.pipeline_mode<synchronous>, transform_indices = @transform_2, window_bounds = array<i64: 1, 256>}, {transform_indices = @transform_3, window_bounds = array<i64: 16, 256>}, {pipeline_mode = #tpu.pipeline_mode<synchronous>, transform_indices = @transform_4, window_bounds = array<i64: 1, 256>}, {pipeline_mode = #tpu.pipeline_mode<synchronous>, transform_indices = @transform_5, window_bounds = array<i64: 1, 256>}, {transform_indices = @transform_6, window_bounds = array<i64: 16, 256>}]} {
    %c0_i32 = arith.constant 0 : i32
    %0 = arith.cmpi eq, %arg1, %c0_i32 : i32
    %1 = arith.extui %0 : i1 to i32
    %c0_i32_0 = arith.constant 0 : i32
    %2 = arith.cmpi ne, %1, %c0_i32_0 : i32
    scf.if %2 {
      %cst_10 = arith.constant 0.000000e+00 : f32
      %12 = vector.broadcast %cst_10 : f32 to vector<16x256xf32>
      %c0_11 = arith.constant 0 : index
      %c0_12 = arith.constant 0 : index
      %13 = vector.load %arg9[%c0_11, %c0_12] : memref<16x256xf32, #tpu.memory_space<vmem>>, vector<16x256xf32>
      tpu.vector_store %arg9[%c0_11, %c0_12], %12 {strides = array<i32>} : memref<16x256xf32, #tpu.memory_space<vmem>>, vector<16x256xf32>,
    } else {
    }
    %c0 = arith.constant 0 : index
    %c0_1 = arith.constant 0 : index
    %3 = vector.load %arg9[%c0, %c0_1] : memref<16x256xf32, #tpu.memory_space<vmem>>, vector<16x256xf32>
    %c0_2 = arith.constant 0 : index
    %c0_3 = arith.constant 0 : index
    %4 = vector.load %arg2[%c0_2, %c0_3] : memref<16x256xbf16, #tpu.memory_space<vmem>>, vector<16x256xbf16>
    %c0_4 = arith.constant 0 : index
    %c0_5 = arith.constant 0 : index
    %5 = vector.load %arg3[%c0_4, %c0_5] : memref<256x256xbf16, #tpu.memory_space<vmem>>, vector<256x256xbf16>
    %cst = arith.constant dense<0.000000e+00> : vector<16x256xf32>
    %6 = tpu.matmul %4, %5, %cst {dimension_numbers = #tpu.dot_dimension_numbers<[1], [0], [0], [1], [0, 0, 1, 1], [], []>} : vector<16x256xbf16>, vector<256x256xbf16>, vector<16x256xf32> -> vector<16x256xf32>
    %7 = arith.addf %3, %6 : vector<16x256xf32>
    %c0_6 = arith.constant 0 : index
    %c0_7 = arith.constant 0 : index
    %8 = vector.load %arg9[%c0_6, %c0_7] : memref<16x256xf32, #tpu.memory_space<vmem>>, vector<16x256xf32>
    tpu.vector_store %arg9[%c0_6, %c0_7], %7 {strides = array<i32>} : memref<16x256xf32, #tpu.memory_space<vmem>>, vector<16x256xf32>,
    %c0_i32_8 = arith.constant 0 : i32
    %9 = arith.cmpi eq, %arg1, %c0_i32_8 : i32
    %10 = arith.extui %9 : i1 to i32
    %c0_i32_9 = arith.constant 0 : i32
    %11 = arith.cmpi ne, %10, %c0_i32_9 : i32
    scf.if %11 {
      %c0_10 = arith.constant 0 : index
      %c0_11 = arith.constant 0 : index
      %12 = vector.load %arg5[%c0_10, %c0_11] : memref<16x256xf32, #tpu.memory_space<vmem>>, vector<16x256xf32>
      %c0_12 = arith.constant 0 : index
      %c0_13 = arith.constant 0 : index
      %13 = vector.load %arg9[%c0_12, %c0_13] : memref<16x256xf32, #tpu.memory_space<vmem>>, vector<16x256xf32>
      %14 = arith.addf %12, %13 : vector<16x256xf32>
      %c0_14 = arith.constant 0 : index
      %c0_15 = arith.constant 0 : index
      %15 = vector.load %arg4[%c0_14, %c0_15] : memref<1x256xf32, #tpu.memory_space<vmem>>, vector<1x256xf32>
      %16 = vector.broadcast %15 : vector<1x256xf32> to vector<16x256xf32>
      %17 = arith.addf %14, %16 : vector<16x256xf32>
      %cst_16 = arith.constant dense<0.000000e+00> : vector<16xf32>
      %18 = vector.multi_reduction <add>, %17, %cst_16 [1] : vector<16x256xf32> to vector<16xf32>
      %19 = vector.shape_cast %18 : vector<16xf32> to vector<16x1xf32>
      %cst_17 = arith.constant 2.560000e+02 : f32
      %20 = vector.broadcast %cst_17 : f32 to vector<16x1xf32>
      %21 = arith.divf %19, %20 : vector<16x1xf32>
      %22 = vector.broadcast %21 : vector<16x1xf32> to vector<16x256xf32>
      %23 = arith.subf %17, %22 : vector<16x256xf32>
      %24 = arith.mulf %23, %23 : vector<16x256xf32>
      %cst_18 = arith.constant dense<0.000000e+00> : vector<16xf32>
      %25 = vector.multi_reduction <add>, %24, %cst_18 [1] : vector<16x256xf32> to vector<16xf32>
      %26 = vector.shape_cast %25 : vector<16xf32> to vector<16x1xf32>
      %cst_19 = arith.constant 2.560000e+02 : f32
      %27 = vector.broadcast %cst_19 : f32 to vector<16x1xf32>
      %28 = arith.divf %26, %27 : vector<16x1xf32>
      %29 = vector.broadcast %21 : vector<16x1xf32> to vector<16x256xf32>
      %30 = arith.subf %17, %29 : vector<16x256xf32>
      %cst_20 = arith.constant 9.99999974E-6 : f32
      %31 = vector.broadcast %cst_20 : f32 to vector<16x1xf32>
      %32 = arith.addf %28, %31 : vector<16x1xf32>
      %33 = math.rsqrt %32 : vector<16x1xf32>
      %34 = vector.broadcast %33 : vector<16x1xf32> to vector<16x256xf32>
      %35 = arith.mulf %30, %34 : vector<16x256xf32>
      %c0_21 = arith.constant 0 : index
      %c0_22 = arith.constant 0 : index
      %36 = vector.load %arg6[%c0_21, %c0_22] : memref<1x256xf32, #tpu.memory_space<vmem>>, vector<1x256xf32>
      %37 = vector.broadcast %36 : vector<1x256xf32> to vector<16x256xf32>
      %38 = arith.mulf %35, %37 : vector<16x256xf32>
      %c0_23 = arith.constant 0 : index
      %c0_24 = arith.constant 0 : index
      %39 = vector.load %arg7[%c0_23, %c0_24] : memref<1x256xf32, #tpu.memory_space<vmem>>, vector<1x256xf32>
      %40 = vector.broadcast %39 : vector<1x256xf32> to vector<16x256xf32>
      %41 = arith.addf %38, %40 : vector<16x256xf32>
      %c0_25 = arith.constant 0 : index
      %c0_26 = arith.constant 0 : index
      %42 = vector.load %arg8[%c0_25, %c0_26] : memref<16x256xf32, #tpu.memory_space<vmem>>, vector<16x256xf32>
      tpu.vector_store %arg8[%c0_25, %c0_26], %41 {strides = array<i32>} : memref<16x256xf32, #tpu.memory_space<vmem>>, vector<16x256xf32>,
    } else {
    }
    return
  }
  func.func @transform_0(%arg0: i32, %arg1: i32) -> (i32, i32) {
    %c0_i32 = arith.constant 0 : i32
    return %arg0, %arg1 : i32, i32
  }
  func.func @transform_1(%arg0: i32, %arg1: i32) -> (i32, i32) {
    %c0_i32 = arith.constant 0 : i32
    %c0_i32_0 = arith.constant 0 : i32
    return %arg1, %c0_i32 : i32, i32
  }
  func.func @transform_2(%arg0: i32, %arg1: i32) -> (i32, i32) {
    %c0_i32 = arith.constant 0 : i32
    %c0_i32_0 = arith.constant 0 : i32
    %c0_i32_1 = arith.constant 0 : i32
    return %c0_i32, %c0_i32_0 : i32, i32
  }
  func.func @transform_3(%arg0: i32, %arg1: i32) -> (i32, i32) {
    %c0_i32 = arith.constant 0 : i32
    %c0_i32_0 = arith.constant 0 : i32
    return %arg0, %c0_i32 : i32, i32
  }
  func.func @transform_4(%arg0: i32, %arg1: i32) -> (i32, i32) {
    %c0_i32 = arith.constant 0 : i32
    %c0_i32_0 = arith.constant 0 : i32
    %c0_i32_1 = arith.constant 0 : i32
    return %c0_i32, %c0_i32_0 : i32, i32
  }
  func.func @transform_5(%arg0: i32, %arg1: i32) -> (i32, i32) {
    %c0_i32 = arith.constant 0 : i32
    %c0_i32_0 = arith.constant 0 : i32
    %c0_i32_1 = arith.constant 0 : i32
    return %c0_i32, %c0_i32_0 : i32, i32
  }
  func.func @transform_6(%arg0: i32, %arg1: i32) -> (i32, i32) {
    %c0_i32 = arith.constant 0 : i32
    %c0_i32_0 = arith.constant 0 : i32
    return %arg0, %c0_i32 : i32, i32
  }
}

module attributes {stable_mosaic.version = 11 : i64} {
  func.func @_matmul_bias_kernel(%arg0: i32, %arg1: i32, %arg2: i32, %arg3: memref<16x256xf32, #tpu.memory_space<vmem>>, %arg4: memref<256x256xbf16, #tpu.memory_space<vmem>>, %arg5: memref<1x256xf32, #tpu.memory_space<vmem>>, %arg6: memref<16x256xbf16, #tpu.memory_space<vmem>>, %arg7: memref<16x256xf32, #tpu.memory_space<vmem>>) attributes {dimension_semantics = [#tpu.dimension_semantics<parallel>, #tpu.dimension_semantics<parallel>, #tpu.dimension_semantics<arbitrary>], iteration_bounds = array<i64: 1, 1, 1>, scalar_prefetch = 0 : i64, scratch_operands = 1 : i64, tpu.core_type = #tpu.core_type<tc>, window_params = [{transform_indices = @transform_0, window_bounds = array<i64: 16, 256>}, {transform_indices = @transform_1, window_bounds = array<i64: 256, 256>}, {transform_indices = @transform_2, window_bounds = array<i64: 1, 256>}, {transform_indices = @transform_3, window_bounds = array<i64: 16, 256>}]} {
    %c0_i32 = arith.constant 0 : i32
    %0 = arith.cmpi eq, %arg2, %c0_i32 : i32
    %1 = arith.extui %0 : i1 to i32
    %c0_i32_0 = arith.constant 0 : i32
    %2 = arith.cmpi ne, %1, %c0_i32_0 : i32
    scf.if %2 {
      %cst_10 = arith.constant 0.000000e+00 : f32
      %13 = vector.broadcast %cst_10 : f32 to vector<16x256xf32>
      %c0_11 = arith.constant 0 : index
      %c0_12 = arith.constant 0 : index
      %14 = vector.load %arg7[%c0_11, %c0_12] : memref<16x256xf32, #tpu.memory_space<vmem>>, vector<16x256xf32>
      tpu.vector_store %arg7[%c0_11, %c0_12], %13 {strides = array<i32>} : memref<16x256xf32, #tpu.memory_space<vmem>>, vector<16x256xf32>,
    } else {
    }
    %c0 = arith.constant 0 : index
    %c0_1 = arith.constant 0 : index
    %3 = vector.load %arg7[%c0, %c0_1] : memref<16x256xf32, #tpu.memory_space<vmem>>, vector<16x256xf32>
    %c0_2 = arith.constant 0 : index
    %c0_3 = arith.constant 0 : index
    %4 = vector.load %arg3[%c0_2, %c0_3] : memref<16x256xf32, #tpu.memory_space<vmem>>, vector<16x256xf32>
    %5 = arith.truncf %4 : vector<16x256xf32> to vector<16x256xbf16>
    %c0_4 = arith.constant 0 : index
    %c0_5 = arith.constant 0 : index
    %6 = vector.load %arg4[%c0_4, %c0_5] : memref<256x256xbf16, #tpu.memory_space<vmem>>, vector<256x256xbf16>
    %cst = arith.constant dense<0.000000e+00> : vector<16x256xf32>
    %7 = tpu.matmul %5, %6, %cst {dimension_numbers = #tpu.dot_dimension_numbers<[1], [0], [0], [1], [0, 0, 1, 1], [], []>} : vector<16x256xbf16>, vector<256x256xbf16>, vector<16x256xf32> -> vector<16x256xf32>
    %8 = arith.addf %3, %7 : vector<16x256xf32>
    %c0_6 = arith.constant 0 : index
    %c0_7 = arith.constant 0 : index
    %9 = vector.load %arg7[%c0_6, %c0_7] : memref<16x256xf32, #tpu.memory_space<vmem>>, vector<16x256xf32>
    tpu.vector_store %arg7[%c0_6, %c0_7], %8 {strides = array<i32>} : memref<16x256xf32, #tpu.memory_space<vmem>>, vector<16x256xf32>,
    %c0_i32_8 = arith.constant 0 : i32
    %10 = arith.cmpi eq, %arg2, %c0_i32_8 : i32
    %11 = arith.extui %10 : i1 to i32
    %c0_i32_9 = arith.constant 0 : i32
    %12 = arith.cmpi ne, %11, %c0_i32_9 : i32
    scf.if %12 {
      %c0_10 = arith.constant 0 : index
      %c0_11 = arith.constant 0 : index
      %13 = vector.load %arg7[%c0_10, %c0_11] : memref<16x256xf32, #tpu.memory_space<vmem>>, vector<16x256xf32>
      %c0_12 = arith.constant 0 : index
      %c0_13 = arith.constant 0 : index
      %14 = vector.load %arg5[%c0_12, %c0_13] : memref<1x256xf32, #tpu.memory_space<vmem>>, vector<1x256xf32>
      %15 = vector.broadcast %14 : vector<1x256xf32> to vector<16x256xf32>
      %16 = arith.addf %13, %15 : vector<16x256xf32>
      %17 = arith.truncf %16 : vector<16x256xf32> to vector<16x256xbf16>
      %c0_14 = arith.constant 0 : index
      %c0_15 = arith.constant 0 : index
      %18 = vector.load %arg6[%c0_14, %c0_15] : memref<16x256xbf16, #tpu.memory_space<vmem>>, vector<16x256xbf16>
      tpu.vector_store %arg6[%c0_14, %c0_15], %17 {strides = array<i32>} : memref<16x256xbf16, #tpu.memory_space<vmem>>, vector<16x256xbf16>,
    } else {
    }
    return
  }
  func.func @transform_0(%arg0: i32, %arg1: i32, %arg2: i32) -> (i32, i32) {
    %c0_i32 = arith.constant 0 : i32
    return %arg0, %arg2 : i32, i32
  }
  func.func @transform_1(%arg0: i32, %arg1: i32, %arg2: i32) -> (i32, i32) {
    %c0_i32 = arith.constant 0 : i32
    return %arg2, %arg1 : i32, i32
  }
  func.func @transform_2(%arg0: i32, %arg1: i32, %arg2: i32) -> (i32, i32) {
    %c0_i32 = arith.constant 0 : i32
    %c0_i32_0 = arith.constant 0 : i32
    return %c0_i32, %arg1 : i32, i32
  }
  func.func @transform_3(%arg0: i32, %arg1: i32, %arg2: i32) -> (i32, i32) {
    %c0_i32 = arith.constant 0 : i32
    return %arg0, %arg1 : i32, i32
  }
}

module attributes {stable_mosaic.version = 11 : i64} {
  func.func @_attn_head_kernel(%arg0: i32, %arg1: i32, %arg2: memref<1x8x128xbf16, #tpu.memory_space<vmem>>, %arg3: memref<1x8x128xbf16, #tpu.memory_space<vmem>>, %arg4: memref<1x8x128xbf16, #tpu.memory_space<vmem>>, %arg5: memref<1x1x8x128xbf16, #tpu.memory_space<vmem>>) attributes {dimension_semantics = [#tpu.dimension_semantics<parallel>, #tpu.dimension_semantics<parallel>], iteration_bounds = array<i64: 2, 2>, scalar_prefetch = 0 : i64, scratch_operands = 0 : i64, tpu.core_type = #tpu.core_type<tc>, window_params = [{transform_indices = @transform_0, window_bounds = array<i64: 1, 8, 128>}, {transform_indices = @transform_1, window_bounds = array<i64: 1, 8, 128>}, {transform_indices = @transform_2, window_bounds = array<i64: 1, 8, 128>}, {transform_indices = @transform_3, window_bounds = array<i64: 1, 1, 8, 128>}]} {
    %c0 = arith.constant 0 : index
    %c0_0 = arith.constant 0 : index
    %c0_1 = arith.constant 0 : index
    %0 = vector.load %arg2[%c0, %c0_0, %c0_1] : memref<1x8x128xbf16, #tpu.memory_space<vmem>>, vector<1x8x128xbf16>
    %1 = vector.shape_cast %0 : vector<1x8x128xbf16> to vector<8x128xbf16>
    %c0_2 = arith.constant 0 : index
    %c0_3 = arith.constant 0 : index
    %c0_4 = arith.constant 0 : index
    %2 = vector.load %arg3[%c0_2, %c0_3, %c0_4] : memref<1x8x128xbf16, #tpu.memory_space<vmem>>, vector<1x8x128xbf16>
    %3 = vector.shape_cast %2 : vector<1x8x128xbf16> to vector<8x128xbf16>
    %c0_5 = arith.constant 0 : index
    %c0_6 = arith.constant 0 : index
    %c0_7 = arith.constant 0 : index
    %4 = vector.load %arg4[%c0_5, %c0_6, %c0_7] : memref<1x8x128xbf16, #tpu.memory_space<vmem>>, vector<1x8x128xbf16>
    %5 = vector.shape_cast %4 : vector<1x8x128xbf16> to vector<8x128xbf16>
    %cst = arith.constant dense<0.000000e+00> : vector<8x8xf32>
    %6 = tpu.matmul %1, %3, %cst {dimension_numbers = #tpu.dot_dimension_numbers<[1], [1], [0], [0], [0, 0, 1, 0], [], []>} : vector<8x128xbf16>, vector<8x128xbf16>, vector<8x8xf32> -> vector<8x8xf32>
    %cst_8 = arith.constant 0.0883883461 : f32
    %7 = vector.broadcast %cst_8 : f32 to vector<8x8xf32>
    %8 = arith.mulf %6, %7 : vector<8x8xf32>
    %cst_9 = arith.constant dense<0xFF800000> : vector<8xf32>
    %9 = vector.multi_reduction <maximumf>, %8, %cst_9 [1] : vector<8x8xf32> to vector<8xf32>
    %10 = vector.shape_cast %9 : vector<8xf32> to vector<8x1xf32>
    %11 = vector.broadcast %10 : vector<8x1xf32> to vector<8x8xf32>
    %12 = arith.subf %8, %11 : vector<8x8xf32>
    %13 = math.exp %12 : vector<8x8xf32>
    %cst_10 = arith.constant dense<0.000000e+00> : vector<8xf32>
    %14 = vector.multi_reduction <add>, %13, %cst_10 [1] : vector<8x8xf32> to vector<8xf32>
    %15 = vector.shape_cast %14 : vector<8xf32> to vector<8x1xf32>
    %16 = tpu.reciprocal %15 {approx = true} : vector<8x1xf32> -> vector<8x1xf32>
    %17 = vector.broadcast %16 : vector<8x1xf32> to vector<8x8xf32>
    %18 = arith.mulf %13, %17 : vector<8x8xf32>
    %19 = arith.truncf %18 : vector<8x8xf32> to vector<8x8xbf16>
    %cst_11 = arith.constant dense<0.000000e+00> : vector<8x128xf32>
    %20 = tpu.matmul %19, %5, %cst_11 {dimension_numbers = #tpu.dot_dimension_numbers<[1], [0], [0], [1], [0, 0, 1, 1], [], []>} : vector<8x8xbf16>, vector<8x128xbf16>, vector<8x128xf32> -> vector<8x128xf32>
    %21 = arith.truncf %20 : vector<8x128xf32> to vector<8x128xbf16>
    %c0_12 = arith.constant 0 : index
    %c0_13 = arith.constant 0 : index
    %c0_14 = arith.constant 0 : index
    %c0_15 = arith.constant 0 : index
    %22 = vector.load %arg5[%c0_12, %c0_13, %c0_14, %c0_15] : memref<1x1x8x128xbf16, #tpu.memory_space<vmem>>, vector<1x1x8x128xbf16>
    %23 = vector.shape_cast %22 : vector<1x1x8x128xbf16> to vector<8x128xbf16>
    %24 = vector.shape_cast %21 : vector<8x128xbf16> to vector<1x1x8x128xbf16>
    tpu.vector_store %arg5[%c0_12, %c0_13, %c0_14, %c0_15], %24 {strides = array<i32>} : memref<1x1x8x128xbf16, #tpu.memory_space<vmem>>, vector<1x1x8x128xbf16>,
    return
  }
  func.func @transform_0(%arg0: i32, %arg1: i32) -> (i32, i32, i32) {
    %c0_i32 = arith.constant 0 : i32
    %0 = arith.addi %c0_i32, %arg1 : i32
    %c0_i32_0 = arith.constant 0 : i32
    %c0_i32_1 = arith.constant 0 : i32
    return %arg0, %c0_i32_0, %0 : i32, i32, i32
  }
  func.func @transform_1(%arg0: i32, %arg1: i32) -> (i32, i32, i32) {
    %c0_i32 = arith.constant 0 : i32
    %0 = arith.addi %c0_i32, %arg1 : i32
    %c0_i32_0 = arith.constant 0 : i32
    %c0_i32_1 = arith.constant 0 : i32
    return %arg0, %c0_i32_0, %0 : i32, i32, i32
  }
  func.func @transform_2(%arg0: i32, %arg1: i32) -> (i32, i32, i32) {
    %c2_i32 = arith.constant 2 : i32
    %0 = arith.addi %c2_i32, %arg1 : i32
    %c0_i32 = arith.constant 0 : i32
    %c0_i32_0 = arith.constant 0 : i32
    return %arg0, %c0_i32, %0 : i32, i32, i32
  }
  func.func @transform_3(%arg0: i32, %arg1: i32) -> (i32, i32, i32, i32) {
    %c0_i32 = arith.constant 0 : i32
    %c0_i32_0 = arith.constant 0 : i32
    %c0_i32_1 = arith.constant 0 : i32
    return %arg0, %arg1, %c0_i32, %c0_i32_0 : i32, i32, i32, i32
  }
}

module attributes {stable_mosaic.version = 11 : i64} {
  func.func @_ffn_add_ln_kernel(%arg0: i32, %arg1: i32, %arg2: memref<16x256xf32, #tpu.memory_space<vmem>>, %arg3: memref<256x256xbf16, #tpu.memory_space<vmem>>, %arg4: memref<1x256xf32, #tpu.memory_space<vmem>>, %arg5: memref<256x256xbf16, #tpu.memory_space<vmem>>, %arg6: memref<1x256xf32, #tpu.memory_space<vmem>>, %arg7: memref<1x256xf32, #tpu.memory_space<vmem>>, %arg8: memref<1x256xf32, #tpu.memory_space<vmem>>, %arg9: memref<16x256xf32, #tpu.memory_space<vmem>>, %arg10: memref<16x256xf32, #tpu.memory_space<vmem>>) attributes {dimension_semantics = [#tpu.dimension_semantics<parallel>, #tpu.dimension_semantics<arbitrary>], iteration_bounds = array<i64: 1, 2>, scalar_prefetch = 0 : i64, scratch_operands = 1 : i64, tpu.core_type = #tpu.core_type<tc>, window_params = [{transform_indices = @transform_0, window_bounds = array<i64: 16, 256>}, {transform_indices = @transform_1, window_bounds = array<i64: 256, 256>}, {transform_indices = @transform_2, window_bounds = array<i64: 1, 256>}, {transform_indices = @transform_3, window_bounds = array<i64: 256, 256>}, {pipeline_mode = #tpu.pipeline_mode<synchronous>, transform_indices = @transform_4, window_bounds = array<i64: 1, 256>}, {pipeline_mode = #tpu.pipeline_mode<synchronous>, transform_indices = @transform_5, window_bounds = array<i64: 1, 256>}, {pipeline_mode = #tpu.pipeline_mode<synchronous>, transform_indices = @transform_6, window_bounds = array<i64: 1, 256>}, {transform_indices = @transform_7, window_bounds = array<i64: 16, 256>}]} {
    %c0_i32 = arith.constant 0 : i32
    %0 = arith.cmpi eq, %arg1, %c0_i32 : i32
    %1 = arith.extui %0 : i1 to i32
    %c0_i32_0 = arith.constant 0 : i32
    %2 = arith.cmpi ne, %1, %c0_i32_0 : i32
    scf.if %2 {
      %cst_14 = arith.constant 0.000000e+00 : f32
      %20 = vector.broadcast %cst_14 : f32 to vector<16x256xf32>
      %c0_15 = arith.constant 0 : index
      %c0_16 = arith.constant 0 : index
      %21 = vector.load %arg10[%c0_15, %c0_16] : memref<16x256xf32, #tpu.memory_space<vmem>>, vector<16x256xf32>
      tpu.vector_store %arg10[%c0_15, %c0_16], %20 {strides = array<i32>} : memref<16x256xf32, #tpu.memory_space<vmem>>, vector<16x256xf32>,
    } else {
    }
    %c0 = arith.constant 0 : index
    %c0_1 = arith.constant 0 : index
    %3 = vector.load %arg2[%c0, %c0_1] : memref<16x256xf32, #tpu.memory_space<vmem>>, vector<16x256xf32>
    %4 = arith.truncf %3 : vector<16x256xf32> to vector<16x256xbf16>
    %c0_2 = arith.constant 0 : index
    %c0_3 = arith.constant 0 : index
    %5 = vector.load %arg3[%c0_2, %c0_3] : memref<256x256xbf16, #tpu.memory_space<vmem>>, vector<256x256xbf16>
    %cst = arith.constant dense<0.000000e+00> : vector<16x256xf32>
    %6 = tpu.matmul %4, %5, %cst {dimension_numbers = #tpu.dot_dimension_numbers<[1], [0], [0], [1], [0, 0, 1, 1], [], []>} : vector<16x256xbf16>, vector<256x256xbf16>, vector<16x256xf32> -> vector<16x256xf32>
    %c0_4 = arith.constant 0 : index
    %c0_5 = arith.constant 0 : index
    %7 = vector.load %arg4[%c0_4, %c0_5] : memref<1x256xf32, #tpu.memory_space<vmem>>, vector<1x256xf32>
    %8 = vector.broadcast %7 : vector<1x256xf32> to vector<16x256xf32>
    %9 = arith.addf %6, %8 : vector<16x256xf32>
    %10 = math.tanh %9 : vector<16x256xf32>
    %c0_6 = arith.constant 0 : index
    %c0_7 = arith.constant 0 : index
    %11 = vector.load %arg10[%c0_6, %c0_7] : memref<16x256xf32, #tpu.memory_space<vmem>>, vector<16x256xf32>
    %12 = arith.truncf %10 : vector<16x256xf32> to vector<16x256xbf16>
    %c0_8 = arith.constant 0 : index
    %c0_9 = arith.constant 0 : index
    %13 = vector.load %arg5[%c0_8, %c0_9] : memref<256x256xbf16, #tpu.memory_space<vmem>>, vector<256x256xbf16>
    %cst_10 = arith.constant dense<0.000000e+00> : vector<16x256xf32>
    %14 = tpu.matmul %12, %13, %cst_10 {dimension_numbers = #tpu.dot_dimension_numbers<[1], [0], [0], [1], [0, 0, 1, 1], [], []>} : vector<16x256xbf16>, vector<256x256xbf16>, vector<16x256xf32> -> vector<16x256xf32>
    %15 = arith.addf %11, %14 : vector<16x256xf32>
    %c0_11 = arith.constant 0 : index
    %c0_12 = arith.constant 0 : index
    %16 = vector.load %arg10[%c0_11, %c0_12] : memref<16x256xf32, #tpu.memory_space<vmem>>, vector<16x256xf32>
    tpu.vector_store %arg10[%c0_11, %c0_12], %15 {strides = array<i32>} : memref<16x256xf32, #tpu.memory_space<vmem>>, vector<16x256xf32>,
    %c1_i32 = arith.constant 1 : i32
    %17 = arith.cmpi eq, %arg1, %c1_i32 : i32
    %18 = arith.extui %17 : i1 to i32
    %c0_i32_13 = arith.constant 0 : i32
    %19 = arith.cmpi ne, %18, %c0_i32_13 : i32
    scf.if %19 {
      %c0_14 = arith.constant 0 : index
      %c0_15 = arith.constant 0 : index
      %20 = vector.load %arg2[%c0_14, %c0_15] : memref<16x256xf32, #tpu.memory_space<vmem>>, vector<16x256xf32>
      %c0_16 = arith.constant 0 : index
      %c0_17 = arith.constant 0 : index
      %21 = vector.load %arg10[%c0_16, %c0_17] : memref<16x256xf32, #tpu.memory_space<vmem>>, vector<16x256xf32>
      %22 = arith.addf %20, %21 : vector<16x256xf32>
      %c0_18 = arith.constant 0 : index
      %c0_19 = arith.constant 0 : index
      %23 = vector.load %arg6[%c0_18, %c0_19] : memref<1x256xf32, #tpu.memory_space<vmem>>, vector<1x256xf32>
      %24 = vector.broadcast %23 : vector<1x256xf32> to vector<16x256xf32>
      %25 = arith.addf %22, %24 : vector<16x256xf32>
      %cst_20 = arith.constant dense<0.000000e+00> : vector<16xf32>
      %26 = vector.multi_reduction <add>, %25, %cst_20 [1] : vector<16x256xf32> to vector<16xf32>
      %27 = vector.shape_cast %26 : vector<16xf32> to vector<16x1xf32>
      %cst_21 = arith.constant 2.560000e+02 : f32
      %28 = vector.broadcast %cst_21 : f32 to vector<16x1xf32>
      %29 = arith.divf %27, %28 : vector<16x1xf32>
      %30 = vector.broadcast %29 : vector<16x1xf32> to vector<16x256xf32>
      %31 = arith.subf %25, %30 : vector<16x256xf32>
      %32 = arith.mulf %31, %31 : vector<16x256xf32>
      %cst_22 = arith.constant dense<0.000000e+00> : vector<16xf32>
      %33 = vector.multi_reduction <add>, %32, %cst_22 [1] : vector<16x256xf32> to vector<16xf32>
      %34 = vector.shape_cast %33 : vector<16xf32> to vector<16x1xf32>
      %cst_23 = arith.constant 2.560000e+02 : f32
      %35 = vector.broadcast %cst_23 : f32 to vector<16x1xf32>
      %36 = arith.divf %34, %35 : vector<16x1xf32>
      %37 = vector.broadcast %29 : vector<16x1xf32> to vector<16x256xf32>
      %38 = arith.subf %25, %37 : vector<16x256xf32>
      %cst_24 = arith.constant 9.99999974E-6 : f32
      %39 = vector.broadcast %cst_24 : f32 to vector<16x1xf32>
      %40 = arith.addf %36, %39 : vector<16x1xf32>
      %41 = math.rsqrt %40 : vector<16x1xf32>
      %42 = vector.broadcast %41 : vector<16x1xf32> to vector<16x256xf32>
      %43 = arith.mulf %38, %42 : vector<16x256xf32>
      %c0_25 = arith.constant 0 : index
      %c0_26 = arith.constant 0 : index
      %44 = vector.load %arg7[%c0_25, %c0_26] : memref<1x256xf32, #tpu.memory_space<vmem>>, vector<1x256xf32>
      %45 = vector.broadcast %44 : vector<1x256xf32> to vector<16x256xf32>
      %46 = arith.mulf %43, %45 : vector<16x256xf32>
      %c0_27 = arith.constant 0 : index
      %c0_28 = arith.constant 0 : index
      %47 = vector.load %arg8[%c0_27, %c0_28] : memref<1x256xf32, #tpu.memory_space<vmem>>, vector<1x256xf32>
      %48 = vector.broadcast %47 : vector<1x256xf32> to vector<16x256xf32>
      %49 = arith.addf %46, %48 : vector<16x256xf32>
      %c0_29 = arith.constant 0 : index
      %c0_30 = arith.constant 0 : index
      %50 = vector.load %arg9[%c0_29, %c0_30] : memref<16x256xf32, #tpu.memory_space<vmem>>, vector<16x256xf32>
      tpu.vector_store %arg9[%c0_29, %c0_30], %49 {strides = array<i32>} : memref<16x256xf32, #tpu.memory_space<vmem>>, vector<16x256xf32>,
    } else {
    }
    return
  }
  func.func @transform_0(%arg0: i32, %arg1: i32) -> (i32, i32) {
    %c0_i32 = arith.constant 0 : i32
    %c0_i32_0 = arith.constant 0 : i32
    return %arg0, %c0_i32 : i32, i32
  }
  func.func @transform_1(%arg0: i32, %arg1: i32) -> (i32, i32) {
    %c0_i32 = arith.constant 0 : i32
    %c0_i32_0 = arith.constant 0 : i32
    return %c0_i32, %arg1 : i32, i32
  }
  func.func @transform_2(%arg0: i32, %arg1: i32) -> (i32, i32) {
    %c0_i32 = arith.constant 0 : i32
    %c0_i32_0 = arith.constant 0 : i32
    return %c0_i32, %arg1 : i32, i32
  }
  func.func @transform_3(%arg0: i32, %arg1: i32) -> (i32, i32) {
    %c0_i32 = arith.constant 0 : i32
    %c0_i32_0 = arith.constant 0 : i32
    return %arg1, %c0_i32 : i32, i32
  }
  func.func @transform_4(%arg0: i32, %arg1: i32) -> (i32, i32) {
    %c0_i32 = arith.constant 0 : i32
    %c0_i32_0 = arith.constant 0 : i32
    %c0_i32_1 = arith.constant 0 : i32
    return %c0_i32, %c0_i32_0 : i32, i32
  }
  func.func @transform_5(%arg0: i32, %arg1: i32) -> (i32, i32) {
    %c0_i32 = arith.constant 0 : i32
    %c0_i32_0 = arith.constant 0 : i32
    %c0_i32_1 = arith.constant 0 : i32
    return %c0_i32, %c0_i32_0 : i32, i32
  }
  func.func @transform_6(%arg0: i32, %arg1: i32) -> (i32, i32) {
    %c0_i32 = arith.constant 0 : i32
    %c0_i32_0 = arith.constant 0 : i32
    %c0_i32_1 = arith.constant 0 : i32
    return %c0_i32, %c0_i32_0 : i32, i32
  }
  func.func @transform_7(%arg0: i32, %arg1: i32) -> (i32, i32) {
    %c0_i32 = arith.constant 0 : i32
    %c0_i32_0 = arith.constant 0 : i32
    return %arg0, %c0_i32 : i32, i32
  }
}

</mosaic_0001>

<bundles_post_ra>
// kernel: decoder_layer_forward.9
= control target key start
LH: loop header
LB: loop body
LE: loop exit
PB: predicated region body
PF: predicated region fallthrough
CT: control target
= control target key end

     0   :  { %s645_s12 = smov 0   ;;  %s647_s13 = smov 0   ;;  %s722_s0 = inlined_call_operand.vmem [shape: bf16[2,8,768], index: 0, kind: input, shape index: {}, may-alias: {0,1,2}]   ;;  %s723_s1 = inlined_call_operand.vmem [shape: bf16[2,8,768], index: 1, kind: input, shape index: {}, may-alias: {0,1,2}]   ;;  %s724_s2 = inlined_call_operand.vmem [shape: bf16[2,8,768], index: 2, kind: input, shape index: {}, may-alias: {0,1,2}]   ;;  %s725_s3 = inlined_call_operand.vmem [shape: bf16[2,2,8,128], index: 3, kind: output, shape index: {}]  }
   0x1   :  { %s649_s14 = smov 0   ;;  %s651_s15 = smov 0  }
   0x2   :  { %s653_s16 = smov 0  }
   0x3 LB: > { %s22_s17 = sadd.s32 1, %s613_s14  ;;  %s25_s18 = sadd.s32 1, %s617_s15  ;;  %s621_s16 = sphi %s653_s16, %s13_s16   ;;  %s617_s15 = sphi %s651_s15, %s729_s15   ;;  %s613_s14 = sphi %s649_s14, %s728_s14   ;;  %s609_s13 = sphi %s647_s13, %s727_s13   ;;  %s605_s12 = sphi %s645_s12, %s726_s12  }
   0x4   : > { %p23_p0 = scmp.ge.s32.totalorder %s22_s17, 2  ;;  %p511_p1 = scmp.ge.s32.totalorder %s621_s16, 1 }
   0x5   : > { %p194_p2 = scmp.lt.s32.totalorder %s621_s16, 5 }
   0x6   : > { %s731_s17 = smov (%p23_p0, %s22_s17), 0  ;;  %s733_s18 = smov (!%p23_p0, %s25_s18), %s617_s15 }
   0x7   : > { %p195_p3 = pnand %p511_p1, %p194_p2  ;;  %p27_p4 = scmp.ge.s32.totalorder %s733_s18, 2 }
   0x8   : > { %p242_p5 = scmp.lt.s32.totalorder (!%p195_p3), %s609_s13, 1  ;;  %s250_s19 = sadd.s32 (!%p195_p3), 2, %s605_s12 }
   0x9   : > { %s735_s18 = smov (%p27_p4, %s733_s18), 0  ;;  %198 = sbr.rel (%p195_p3) target bundleno = 736 (0x2e0), region = 32 }
   0xa   : > { %p253_p6 = scmp.lt.s32.totalorder (!%p195_p3), %s250_s19, 5  ;;  %p244_p7 = scmp.lt.s32.totalorder (!%p195_p3), %s605_s12, 5 }
   0xb   : > { %s260_s5 = sadd.s32 (!%p195_p3), 4, %s605_s12  ;;  %p272_p9 = scmp.lt.s32.totalorder (!%p195_p3), %s605_s12, 1 }
   0xc   : > { %p263_p8 = scmp.lt.s32.totalorder (!%p195_p3), %s260_s5, 5 }
   0xe   : > { %v623_v0 = vmov 0.0   ;;  %vm624_vm0 = vmmov 0   ;;  %s737_s13 = smov (!%p242_p5, %s609_s13), 1  ;;  %s739_s19 = smov (!%p253_p6, %s250_s19), 5  ;;  %vm323_vm1 = vcmask 64512   ;;  %vm339_vm2 = vcmask 1043456  }
   0xf   : > { %524 = vmatprep.subr.bf16.mxu0 %v623_v0  ;;  %526 = vmatprep.mubr.msk.bf16.mxu0 %vm624_vm0, %v623_v0  ;;  %s682_s20 = smul.u32 6, %s737_s13  ;;  %s741_s5 = smov (!%p263_p8, %s260_s5), 5 }
  0x10   : > { %530 = vmatprep.subr.bf16.mxu1 %v623_v0  ;;  %532 = vmatprep.mubr.msk.bf16.mxu1 %vm624_vm0, %v623_v0  ;;  %s245_s21 = scalar_select %p244_p7, %s605_s12, 5 }
  0x11   : > { %s256_s22 = sadd.s32 %s682_s20, %s739_s19  ;;  %s266_s6 = sadd.s32 %s682_s20, %s741_s5 }
  0x12   : > { %s513_s23 = sshll.u32 %s256_s22, 2  ;;  %s247_s24 = sadd.s32 %s682_s20, %s245_s21 }
  0x13   : > { %s258_s27 = scalar_lea.vmem %s723_s1, %s513_s23  ;;  %s512_s28 = sshll.u32 %s247_s24, 2 }
  0x14   : > { %v280_v1 = vld [vmem:[%s258_s27] sm:$0xf]  ;;  %s249_s4 = scalar_lea.vmem %s722_s0, %s512_s28  ;;  %s514_s7 = sshll.u32 %s266_s6, 2 }
  0x15   : > { %525 = vmatpush3.bf16.xpose.msra.mxu0 %v280_v1  ;;  %v279_v2 = vld [vmem:[%s249_s4] sm:$0xf]  ;;  %s268_s10 = scalar_lea.vmem %s724_s2, %s514_s7  ;;  %s743_s12 = smov (!%p272_p9, %s605_s12), 1 }
  0x16   : > { %v281_v14 = vld [vmem:[%s268_s10] sm:$0xf]  ;;  %s515_s11 = sshll.u32 %s737_s13, 1 }
  0x17   : > { %v341_v15 = vsel %vm339_vm2, %v281_v14, 0  ;;  %s275_s19 = sadd.s32 %s515_s11, %s743_s12 }
  0x18   : > { %531 = vmatpush3.bf16.msra.mxu1 %v341_v15  ;;  %s516_s20 = sshll.u32 %s275_s19, 2 }
  0x19   : > { %s277_s23 = scalar_lea.vmem %s725_s3, %s516_s20 }
  0x1c   : > { %527 = vmatmul.mubr.bf16.vlgmr.msra.gmra.mxu0 %v279_v2 }
  0xdc   : > { %v316_v3 = vpop.f32.mrf.mxu0 }
  0xdd   : > { %v322_v4 = vmul.f32 0.088388346, %v316_v3 }
  0xde   : > { %v528_v5 = vpop.f32.mrf.mxu0 }
  0xdf   : > { %v324_v6 = vsel %vm323_vm1, %v322_v4, -inf }
  0xe0   : > { %325 = vmax.xlane.f32.xlu0 %v324_v6  ;;  %v319_v7 = vpop.f32.mrf.mxu0 }
  0xe2   : > { %v529_v8 = vpop.f32.mrf.mxu0 }
 0x169   : > { %v326_v9 = vpop.xlane.xlu0 %325 }
 0x16a   : > { %v327_v10 = vsub.f32 %v322_v4, %v326_v9 }
 0x16c   : > { %v328_v11 = vmul.f32 1.442695, %v327_v10 }
 0x16e   : > { %579 = vpow2.f32 %v328_v11 }
 0x17b   : > { %v580_v12 = vpop.eup %579 }
 0x17c   : > { %v330_v13 = vsel %vm323_vm1, %v580_v12, 0.0 }
 0x17d   : > { %331 = vadd.xlane.f32.xlu0 %v330_v13 }
 0x206   : > { %v332_v16 = vpop.xlane.xlu0 %331 }
 0x207   : > { %581 = vrcp.f32 %v332_v16 }
 0x214   : > { %v582_v17 = vpop.eup %581 }
 0x215   : > { %v334_v18 = vmul.f32 %v582_v17, %v580_v12 }
 0x217   : > { %v335_v19 = vpack.c.bf16 %v334_v18, %v334_v18 }
 0x219   : > { %533 = vmatmul.mubr.msk.bf16.vlgmr.msra.gmra.mxu1 %vm323_vm1, %v335_v19 }
 0x2d9   : > { %v377_v20 = vpop.f32.mrf.mxu1 }
 0x2da   : > { %v383_v21 = vpack.c.bf16 %v377_v20, %v377_v20 }
 0x2db   : > { %v534_v22 = vpop.f32.mrf.mxu1 }
 0x2dc   : > { %384 = vst [vmem:[%s277_s23] sm:$0xf] %v383_v21 }
 0x2dd   : > { %v380_v23 = vpop.f32.mrf.mxu1 }
 0x2df   : > { %v535_v24 = vpop.f32.mrf.mxu1 }
 0x2e0 PF: > { %s13_s16 = sadd.s32 1, %s621_s16   ;;  %s726_s12 = smov %s613_s14 }
 0x2e1   : > { %p10_p10 = scmp.ge.s32.totalorder %s13_s16, 6   ;;  %s727_s13 = smov %s617_s15 }
 0x2e2   : > { %s728_s14 = smov %s731_s17  ;;  %s729_s15 = smov %s735_s18 }
 0x2e3   :  { %12 = sbr.rel (!%p10_p10) target bundleno = 3 (0x3), region = 68 }

// kernel: decoder_layer_forward.8
= control target key start
LH: loop header
LB: loop body
LE: loop exit
PB: predicated region body
PF: predicated region fallthrough
CT: control target
= control target key end

     0   :  { %8 = vsyncpa [#allocation4], 0  ;;  %s1155_s0 = inlined_call_operand.vmem [shape: f32[16,256], index: 0, kind: input, shape index: {}]   ;;  %s1156_s1 = inlined_call_operand.hbm [shape: bf16[256,768], index: 1, kind: input, shape index: {}]   ;;  %s1157_s2 = inlined_call_operand.vmem [shape: f32[1,768], index: 2, kind: input, shape index: {}]   ;;  %s1158_s3 = inlined_call_operand.vmem [shape: bf16[16,768], index: 3, kind: output, shape index: {}]  }
   0x1   :  { %10 = vsyncpa [#allocation4 + $0x1], 0  ;;  %s997_s12 = smov 0   ;;  %s999_s13 = smov 0  }
   0x2   :  { %s1001_s14 = smov 0   ;;  %s1003_s15 = smov 0  }
   0x3   :  { %s1005_s16 = smov 0   ;;  %s1007_s17 = smov 0  }
   0x4 LB: > { %s732_s18 = sadd.s32 4294967295, %s971_s17   ;;  %s31_s19 = sadd.s32 1, %s967_s16  ;;  %s971_s17 = sphi %s1007_s17, %s16_s17   ;;  %s967_s16 = sphi %s1005_s16, %s1167_s16   ;;  %s963_s15 = sphi %s1003_s15, %s1166_s15   ;;  %s959_s14 = sphi %s1001_s14, %s1165_s14   ;;  %s955_s13 = sphi %s999_s13, %s1164_s13   ;;  %s951_s12 = sphi %s997_s12, %s1163_s12  }
   0x5   : > { %p33_p0 = scmp.ge.s32.totalorder %s31_s19, 3  ;;  %s72_s20 = sadd.s32 1, %s959_s14 }
   0x6   : > { %p79_p1 = scmp.ne.s32.totalorder %s959_s14, %s955_s13  ;;  %p80_p2 = scmp.eq.s32.totalorder %s971_s17, 0 }
   0x7   : > { %s1169_s19 = smov (%p33_p0, %s31_s19), 0  ;;  %p85_p4 = scmp.ne.s32.totalorder %s955_s13, %s951_s12 }
   0x8   : > { %p1033_p3 = por %p80_p2, %p79_p1  ;;  %s68_s22 = ssub.s32 %s967_s16, %s1169_s19 }
   0x9   : > { %p86_p5 = scmp.eq.s32.totalorder %s732_s18, 0  ;;  %p70_p6 = scmp.eq.s32.totalorder %s68_s22, 0 }
   0xa   : > { %p137_p7 = scmp.eq.s32.totalorder %s732_s18, 2  ;;  %p793_p10 = scmp.lt.s32.totalorder %s971_s17, 3 }
   0xb   : > { %p1040_p8 = por %p86_p5, %p85_p4  ;;  %s178_s26 = sand.u32 1, %s959_s14  }
   0xc   : > { %s1045_s24 = scalar_select %p70_p6, %s959_s14, %s72_s20  }
   0xd   : > { %p1047_p9 = por %p137_p7, %p79_p1  ;;  %s783_s27 = sshll.u32 %s967_s16, 7 }
   0xe   : > { %s737_s28 = sshll.u32 %s178_s26, 8  ;;  %s191_s4 = scalar_lea.hbm %s1156_s1, %s783_s27 }
   0xf   : > { %s182_s5 = scalar_lea.vmem [#allocation3], %s737_s28  ;;  %p1059_p11 = pnand %p793_p10, %p1033_p3 }
  0x10   : > { %s192_s6 = sshll.u32 %s182_s5, 4  ;;  %p740_p12 = scmp.ge.s32.totalorder %s971_s17, 1  ;;  %s193_s6 = int_to_ptr.vmem [resolvable:$true] %s192_s6 }
  0x11   : > { %s179_s8 = scalar_lea.sflag [#allocation4], %s178_s26  ;;  %p895_p13 = pneg %p1059_p11 }
  0x12   : > { %s906_s9 = scalar_lea.vmem %s193_s6, 4096  ;;  %s973_s10 = smov [#allocation3]  }
  0x13   : > { %p907_p0 = scmp.ne.s32.totalorder %s193_s6, %s906_s9  ;;  %s911_s11 = sshll.u32 %s973_s10, 4  ;;  %s912_s11 = int_to_ptr.vmem [resolvable:$false] %s911_s11 }
  0x14   : > { %s913_s12 = scalar_lea.vmem %s912_s11, 8192  ;;  %p914_p4 = scmp.lt.s32.totalorder %s193_s6, %s912_s11 }
  0x15   : > { %p909_p1 = pnand %p907_p0, %p895_p13  ;;  %p915_p5 = scmp.lt.s32.totalorder %s913_s12, %s906_s9 }
  0x17   : > { %p910_p2 = pneg %p909_p1  ;;  %p916_p3 = por %p915_p5, %p914_p4 }
  0x19   : > { %p917_p6 = pnand %p916_p3, %p910_p2 }
  0x1b   : > { %920 = shalt.err (!%p917_p6)
}
  0x1c   : > { %s974_s18 = smov 384   ;;  %s975_s20 = smov 128  }
  0x1d   : > { %s976_s21 = smov 8   ;;  %p208_p7 = scmp.lt.s32.totalorder %s971_s17, 4 }
  0x1e   : > { %792 = dma.hbm_to_vmem [thread:$0]  (!%p1059_p11), %s191_s4, 4096, %s193_s6, %s179_s8, %s974_s18, %s975_s20, %s976_s21  }
  0x1f   : > { %p209_p10 = pnand %p740_p12, %p208_p7 }
  0x20   : > { %s1072_s22 = sand.u32 (!%p209_p10), 1, %s955_s13  }
  0x21   : > { %212 = sbr.rel (%p209_p10) target bundleno = 316 (0x13c), region = 32  ;;  %s741_s26 = sshll.u32 (!%p209_p10), %s1072_s22, 8 }
  0x22   : > { %s215_s27 = scalar_lea.sflag (!%p209_p10), [#allocation4], %s1072_s22  ;;  %s1076_s28 = scalar_lea.vmem (!%p209_p10), [#allocation3], %s741_s26 }
  0x26   : > { %946 = dma.done.wait (%p1040_p8), %s215_s27, 4096  }
  0x27   : > { %948 = vsyncadd (%p1040_p8), %s215_s27, 4294963200  ;;  %v845_v0 = vld [vmem:[%s1076_s28 + $0x74] ss:$8 sps:$4 sm:$0xff]   ;;  %v847_v1 = vld [vmem:[%s1076_s28 + $0x70] ss:$8 sps:$4 sm:$0xff]   ;;  %s743_s9 = sshll.u32 %s963_s15, 1  ;;  %v545_v38 = vlaneseq }
  0x28   : > { %485 = vmatprep.subr.bf16.mxu0 %v845_v0  ;;  %v848_v2 = vld [vmem:[%s1076_s28 + $0x64] ss:$8 sps:$4 sm:$0xff]   ;;  %v850_v3 = vld [vmem:[%s1076_s28 + $0x60] ss:$8 sps:$4 sm:$0xff]   ;;  %v851_v4 = vld [vmem:[%s1076_s28 + $0x54] ss:$8 sps:$4 sm:$0xff]  }
  0x29   : > { %486 = vmatpush1.bf16.msra.mxu0 %v847_v1  ;;  %v853_v5 = vld [vmem:[%s1076_s28 + $0x50] ss:$8 sps:$4 sm:$0xff]   ;;  %v854_v6 = vld [vmem:[%s1076_s28 + $0x44] ss:$8 sps:$4 sm:$0xff]   ;;  %v856_v7 = vld [vmem:[%s1076_s28 + $0x40] ss:$8 sps:$4 sm:$0xff]  }
  0x2a   : > { %487 = vmatprep.subr.bf16.mxu0 %v848_v2  ;;  %v857_v8 = vld [vmem:[%s1076_s28 + $0x34] ss:$8 sps:$4 sm:$0xff]   ;;  %v859_v9 = vld [vmem:[%s1076_s28 + $0x30] ss:$8 sps:$4 sm:$0xff]   ;;  %v860_v10 = vld [vmem:[%s1076_s28 + $0x24] ss:$8 sps:$4 sm:$0xff]  }
  0x2b   : > { %v862_v11 = vld [vmem:[%s1076_s28 + $0x20] ss:$8 sps:$4 sm:$0xff]   ;;  %v863_v12 = vld [vmem:[%s1076_s28 + $0x14] ss:$8 sps:$4 sm:$0xff]   ;;  %v865_v16 = vld [vmem:[%s1076_s28 + $0x10] ss:$8 sps:$4 sm:$0xff]  }
  0x2c   : > { %v288_v13 = vld [vmem:[%s1155_s0 + $0x8] sm:$0xff]  ;;  %v290_v14 = vld [vmem:[%s1155_s0 + $0x18] sm:$0xff]  ;;  %v287_v35 = vld [vmem:[%s1155_s0] sm:$0xff]  ;;  %p269_p8 = scmp.lt.s32.totalorder %s743_s9, 5  ;;  %v546_v39 = vshrl.u32 %v545_v38, 7  ;;  %s742_s18 = sshll.u32 %s1072_s22, 4 }
  0x2d   : > { %488 = vmatpush1.bf16.msra.mxu0 %v850_v3  ;;  %v292_v15 = vpack.c.bf16 %v290_v14, %v288_v13  ;;  %v866_v17 = vld [vmem:[%s1076_s28 + $0x4] ss:$8 sps:$4 sm:$0xff]   ;;  %v868_v18 = vld [vmem:[%s1076_s28] ss:$8 sps:$4 sm:$0xff]   ;;  %v869_v19 = vld [vmem:[%s1076_s28 + $0xf4] ss:$8 sps:$4 sm:$0xff]  }
  0x2e   : > { %489 = vmatprep.subr.bf16.mxu0 %v851_v4  ;;  %v871_v20 = vld [vmem:[%s1076_s28 + $0xf0] ss:$8 sps:$4 sm:$0xff]   ;;  %v872_v21 = vld [vmem:[%s1076_s28 + $0xe4] ss:$8 sps:$4 sm:$0xff]   ;;  %v874_v22 = vld [vmem:[%s1076_s28 + $0xe0] ss:$8 sps:$4 sm:$0xff]  }
  0x2f   : > { %517 = vmatprep.mubr.bf16.mxu0 %v292_v15  ;;  %v875_v23 = vld [vmem:[%s1076_s28 + $0xd4] ss:$8 sps:$4 sm:$0xff]   ;;  %v877_v24 = vld [vmem:[%s1076_s28 + $0xd0] ss:$8 sps:$4 sm:$0xff]   ;;  %v878_v25 = vld [vmem:[%s1076_s28 + $0xc4] ss:$8 sps:$4 sm:$0xff]  }
  0x30   : > { %v880_v26 = vld [vmem:[%s1076_s28 + $0xc0] ss:$8 sps:$4 sm:$0xff]   ;;  %v881_v27 = vld [vmem:[%s1076_s28 + $0xb4] ss:$8 sps:$4 sm:$0xff]   ;;  %v883_v28 = vld [vmem:[%s1076_s28 + $0xb0] ss:$8 sps:$4 sm:$0xff]  }
  0x31   : > { %490 = vmatpush1.bf16.msra.mxu0 %v853_v5  ;;  %v884_v29 = vld [vmem:[%s1076_s28 + $0xa4] ss:$8 sps:$4 sm:$0xff]   ;;  %v886_v30 = vld [vmem:[%s1076_s28 + $0xa0] ss:$8 sps:$4 sm:$0xff]   ;;  %v887_v31 = vld [vmem:[%s1076_s28 + $0x94] ss:$8 sps:$4 sm:$0xff]  }
  0x32   : > { %491 = vmatprep.subr.bf16.mxu0 %v854_v6  ;;  %v889_v32 = vld [vmem:[%s1076_s28 + $0x90] ss:$8 sps:$4 sm:$0xff]   ;;  %v890_v33 = vld [vmem:[%s1076_s28 + $0x84] ss:$8 sps:$4 sm:$0xff]   ;;  %v892_v34 = vld [vmem:[%s1076_s28 + $0x80] ss:$8 sps:$4 sm:$0xff]  }
  0x33   : > { %v289_v36 = vld [vmem:[%s1155_s0 + $0x10] sm:$0xff]  ;;  %s1171_s9 = smov (!%p269_p8, %s743_s9), 5  ;;  %v547_v40 = vsub.s32 0, %v546_v39  ;;  %v551_v41 = vsub.s32 1, %v546_v39  ;;  %s253_s20 = scalar_lea.vmem [#allocation5], %s742_s18 }
  0x34   : > { %v291_v37 = vpack.c.bf16 %v289_v36, %v287_v35  ;;  %s271_s12 = scalar_lea.vmem %s1157_s2, %s1171_s9  ;;  %s786_s21 = sshll.u32 (%p1047_p9), %s963_s15, 3 }
  0x35   : > { %492 = vmatpush1.bf16.msra.mxu0 %v856_v7  ;;  %v543_v42 = vld [vmem:[%s271_s12] sm:$0x3]  ;;  %s585_s27 = scalar_lea.vmem (%p1047_p9), %s1158_s3, %s786_s21 }
  0x36   : > { %493 = vmatprep.subr.bf16.mxu0 %v857_v8  ;;  %v548_v43 = vrot.slane %v543_v42, %v547_v40  ;;  %v552_v44 = vrot.slane %v543_v42, %v551_v41 }
  0x39   : > { %494 = vmatpush1.bf16.msra.mxu0 %v859_v9 }
  0x3a   : > { %495 = vmatprep.subr.bf16.mxu0 %v860_v10 }
  0x3d   : > { %496 = vmatpush1.bf16.msra.mxu0 %v862_v11 }
  0x3e   : > { %497 = vmatprep.subr.bf16.mxu0 %v863_v12 }
  0x41   : > { %498 = vmatpush1.bf16.msra.mxu0 %v865_v16 }
  0x42   : > { %499 = vmatprep.subr.bf16.mxu0 %v866_v17 }
  0x45   : > { %500 = vmatpush1.bf16.msra.mxu0 %v868_v18 }
  0x46   : > { %501 = vmatprep.subr.bf16.mxu0 %v869_v19 }
  0x49   : > { %502 = vmatpush2.bf16.msra.mxu0 %v871_v20 }
  0x4a   : > { %503 = vmatprep.subr.bf16.mxu0 %v872_v21 }
  0x4d   : > { %504 = vmatpush2.bf16.msra.mxu0 %v874_v22 }
  0x4e   : > { %505 = vmatprep.subr.bf16.mxu0 %v875_v23 }
  0x51   : > { %506 = vmatpush2.bf16.msra.mxu0 %v877_v24 }
  0x52   : > { %507 = vmatprep.subr.bf16.mxu0 %v878_v25 }
  0x55   : > { %508 = vmatpush2.bf16.msra.mxu0 %v880_v26 }
  0x56   : > { %509 = vmatprep.subr.bf16.mxu0 %v881_v27 }
  0x59   : > { %510 = vmatpush2.bf16.msra.mxu0 %v883_v28 }
  0x5a   : > { %511 = vmatprep.subr.bf16.mxu0 %v884_v29 }
  0x5d   : > { %512 = vmatpush2.bf16.msra.mxu0 %v886_v30 }
  0x5e   : > { %513 = vmatprep.subr.bf16.mxu0 %v887_v31 }
  0x61   : > { %514 = vmatpush2.bf16.msra.mxu0 %v889_v32 }
  0x62   : > { %515 = vmatprep.subr.bf16.mxu0 %v890_v33 }
  0x65   : > { %516 = vmatpush2.bf16.msra.mxu0 %v892_v34 }
  0x68   : > { %518 = vmatmul.mubr.bf16.vlgmr.msra.gmra.mxu0 %v291_v37 }
 0x128   : > { %v519_v45 = vpop.f32.mrf.mxu0 }
 0x129   : > { %v555_v47 = vadd.f32 %v548_v43, %v519_v45 }
 0x12a   : > { %v521_v46 = vpop.f32.mrf.mxu0 }
 0x12b   : > { %v556_v48 = vadd.f32 %v552_v44, %v521_v46 }
 0x12c   : > { %v523_v49 = vpop.f32.mrf.mxu0 }
 0x12d   : > { %v784_v50 = vpack.c.bf16 %v556_v48, %v555_v47  ;;  %v557_v52 = vadd.f32 %v548_v43, %v523_v49 }
 0x12e   : > { %v525_v51 = vpop.f32.mrf.mxu0 }
 0x12f   : > { %571 = vst [vmem:[%s253_s20] sm:$0xff] %v784_v50  ;;  %v558_v53 = vadd.f32 %v552_v44, %v525_v51  ;;  %579 = sbr.rel (!%p1047_p9) target bundleno = 316 (0x13c), region = 48 }
 0x131   : > { %v785_v54 = vpack.c.bf16 %v558_v53, %v557_v52 }
 0x133   : > { %572 = vst [vmem:[%s253_s20 + $0x8] sm:$0xff] %v785_v54 }
 0x136   : > { %v616_v55 = vld [vmem:[%s253_s20] sm:$0xff] }
 0x137   : > { %617 = vst [vmem:[%s585_s27] sm:$0xff] %v616_v55 }
 0x13a   : > { %v618_v56 = vld [vmem:[%s253_s20 + $0x8] sm:$0xff] }
 0x13b   : > { %619 = vst [vmem:[%s585_s27 + $0x18] sm:$0xff] %v618_v56 }
 0x13c PF: > { %s16_s17 = sadd.s32 1, %s971_s17   ;;  %s1163_s12 = smov %s955_s13 }
 0x13d   : > { %p13_p11 = scmp.ge.s32.totalorder %s16_s17, 5   ;;  %s1164_s13 = smov %s959_s14 }
 0x13e   : > { %s1165_s14 = smov %s1045_s24  ;;  %s1166_s15 = smov %s967_s16 }
 0x13f   : > { %s1167_s16 = smov %s1169_s19  ;;  %15 = sbr.rel (!%p13_p11) target bundleno = 4 (0x4), region = 124 }
 0x144   :  { %635 = vsyncpa [#allocation4], 1 }
 0x145   :  { %637 = vsyncpa [#allocation4 + $0x1], 1 }

// kernel: decoder_layer_forward.12
= control target key start
LH: loop header
LB: loop body
LE: loop exit
PB: predicated region body
PF: predicated region fallthrough
CT: control target
= control target key end

     0   :  { %8 = vsyncpa [#allocation4], 0  ;;  %s1205_s0 = inlined_call_operand.hbm [shape: f32[16,256], index: 0, kind: input, shape index: {}]   ;;  %s1206_s1 = inlined_call_operand.hbm [shape: bf16[256,512], index: 1, kind: input, shape index: {}]   ;;  %s1207_s2 = inlined_call_operand.vmem [shape: f32[1,512], index: 2, kind: input, shape index: {}]   ;;  %s1208_s3 = inlined_call_operand.vmem [shape: bf16[16,512], index: 3, kind: output, shape index: {}]  }
   0x1   :  { %9 = vsyncpa [#allocation6], 0 }
   0x2   :  { %11 = vsyncpa [#allocation6 + $0x1], 0  ;;  %s1027_s12 = smov 0   ;;  %s1029_s13 = smov 0  }
   0x3   :  { %s1031_s14 = smov 0   ;;  %s1033_s15 = smov 0  }
   0x4   :  { %s1035_s16 = smov 0   ;;  %s1037_s17 = smov 0  }
   0x5 LB: > { %1213 = sst [smem:[#allocation10_spill]] %s999_s17  ;;  %s717_s18 = sadd.s32 4294967295, %s999_s17   ;;  %s999_s17 = sphi %s1037_s17, %s17_s17   ;;  %s995_s16 = sphi %s1035_s16, %s1229_s16   ;;  %s991_s15 = sphi %s1033_s15, %s1228_s15   ;;  %s987_s14 = sphi %s1031_s14, %s1227_s14   ;;  %s983_s13 = sphi %s1029_s13, %s1226_s13   ;;  %s979_s12 = sphi %s1027_s12, %s1225_s12  }
   0x6   : > { %p80_p0 = scmp.ne.s32.totalorder %s987_s14, %s983_s13  ;;  %p81_p1 = scmp.eq.s32.totalorder %s999_s17, 0 }
   0x7   : > { %p86_p2 = scmp.ne.s32.totalorder %s983_s13, %s979_s12  ;;  %p1060_p3 = scmp.eq.s32.totalorder %s717_s18, 0 }
   0x8   : > { %p138_p4 = scmp.eq.s32.totalorder %s717_s18, 1  ;;  %p82_p5 = por %p81_p1, %p80_p0 }
   0x9   : > { %s1214_s19 = scalar_select %p1060_p3, 1, 0 }
   0xa   : > { %p719_p6 = scmp.ge.s32.totalorder %s999_s17, 1  ;;  %p1067_p7 = por %p1060_p3, %p86_p2 }
   0xb   : > { %p1071_p8 = por %p138_p4, %p80_p0  ;;  %p151_p9 = scmp.lt.s32.totalorder %s999_s17, 3 }
   0xc   : > { %s1215_s20 = scalar_select %p1067_p7, 1, 0 }
   0xd   : > { %s1216_s21 = scalar_select %p1071_p8, 1, 0 }
   0xe   : > { %p1076_p10 = pnand %p719_p6, %p151_p9  ;;  %s1001_s23 = smov [#allocation3]  }
   0xf   : > { %s169_s24 = sshll.u32 %s1001_s23, 4  ;;  %p788_p12 = scmp.lt.s32.totalorder %s999_s17, 2  ;;  %s170_s24 = int_to_ptr.vmem [resolvable:$true] %s169_s24 }
  0x10   : > { %p779_p11 = pneg %p1076_p10  ;;  %s32_s27 = sadd.s32 1, %s995_s16 }
  0x11   : > { %p1089_p0 = pnand %p788_p12, %p82_p5  ;;  %p1094_p1 = scmp.ge.s32.totalorder %s32_s27, 2 }
  0x12   : > { %p1085_p13 = pnand %p779_p11, %p1060_p3  ;;  %s902_s29 = scalar_lea.vmem %s170_s24, 512 }
  0x13   : > { %p903_p4 = scmp.ne.s32.totalorder %s170_s24, %s902_s29  ;;  %p910_p11 = scmp.lt.s32.totalorder %s170_s24, %s170_s24 }
  0x14   : > { %p893_p2 = pneg %p1085_p13  ;;  %p911_p8 = scmp.lt.s32.totalorder %s902_s29, %s902_s29 }
  0x16   : > { %p905_p6 = pnand %p903_p4, %p893_p2  ;;  %p912_p7 = por %p911_p8, %p910_p11 }
  0x18   : > { %p906_p9 = pneg %p905_p6 }
  0x1a   : > { %p913_p3 = pnand %p912_p7, %p906_p9 }
  0x1c   : > { %916 = shalt.err (!%p913_p3)
}
  0x1d   : > { %s1002_s30 = smov 256   ;;  %s1003_s4 = smov 16  }
  0x1e   : > { %782 = dma.hbm_to_vmem [thread:$0]  (!%p1085_p13), %s1205_s0, 512, %s170_s24, [#allocation4], %s1002_s30, %s1002_s30, %s1003_s4  }
  0x1f   : > { %s73_s7 = sadd.s32 1, %s987_s14  ;;  %s1231_s27 = smov (%p1094_p1, %s32_s27), 0 }
  0x20   : > { %s183_s8 = sand.u32 1, %s987_s14   ;;  %s769_s9 = sshll.u32 %s995_s16, 7 }
  0x21   : > { %s69_s10 = ssub.s32 %s995_s16, %s1231_s27  ;;  %s722_s11 = sshll.u32 %s183_s8, 8 }
  0x22   : > { %p71_p3 = scmp.eq.s32.totalorder %s69_s10, 0  ;;  %s196_s23 = scalar_lea.hbm %s1206_s1, %s769_s9 }
  0x23   : > { %s187_s29 = scalar_lea.vmem [#allocation5], %s722_s11  ;;  %s184_s24 = scalar_lea.sflag [#allocation6], %s183_s8 }
  0x24   : > { %s1120_s25 = scalar_select %p71_p3, %s987_s14, %s73_s7  }
  0x25   : > { %s197_s17 = sshll.u32 %s187_s29, 4  ;;  %p919_p5 = pneg %p1089_p0  ;;  %s198_s17 = int_to_ptr.vmem [resolvable:$true] %s197_s17 }
  0x26   : > { %s930_s28 = scalar_lea.vmem %s198_s17, 4096  ;;  %s1004_s4 = smov [#allocation5]  }
  0x27   : > { %p931_p7 = scmp.ne.s32.totalorder %s198_s17, %s930_s28  ;;  %s935_s5 = sshll.u32 %s1004_s4, 4  ;;  %s936_s5 = int_to_ptr.vmem [resolvable:$false] %s935_s5 }
  0x28   : > { %s937_s6 = scalar_lea.vmem %s936_s5, 8192  ;;  %p938_p13 = scmp.lt.s32.totalorder %s198_s17, %s936_s5 }
  0x29   : > { %p933_p8 = pnand %p931_p7, %p919_p5  ;;  %p939_p1 = scmp.lt.s32.totalorder %s937_s6, %s930_s28 }
  0x2b   : > { %p934_p12 = pneg %p933_p8  ;;  %p940_p2 = por %p939_p1, %p938_p13 }
  0x2d   : > { %p941_p4 = pnand %p940_p2, %p934_p12 }
  0x2f   : > { %944 = shalt.err (!%p941_p4)
}
  0x30   : > { %s1005_s7 = smov 128   ;;  %s1006_s9 = smov 8  }
  0x31   : > { %786 = dma.hbm_to_vmem [thread:$0]  (!%p1089_p0), %s196_s23, 4096, %s198_s17, %s184_s24, %s1002_s30, %s1005_s7, %s1006_s9  }
  0x32   : > { %217 = sbr.rel (%p1076_p10) target bundleno = 337 (0x151), region = 32  ;;  %p1221_p6 = scmp.ne.s32.totalorder (!%p1076_p10), %s1214_s19, 0 }
  0x37   : > { %970 = dma.done.wait (%p1221_p6), [#allocation4], 512  }
  0x38   : > { %972 = vsyncadd (%p1221_p6), [#allocation4], 4294966784  ;;  %s1134_s8 = sand.u32 1, %s983_s13   ;;  %p1222_p0 = scmp.ne.s32.totalorder %s1215_s20, 0 }
  0x39   : > { %s727_s10 = sshll.u32 %s1134_s8, 8  ;;  %s224_s11 = scalar_lea.sflag [#allocation6], %s1134_s8 }
  0x3a   : > { %s1138_s26 = scalar_lea.vmem [#allocation5], %s727_s10 }
  0x3b   : > { %974 = dma.done.wait (%p1222_p0), %s224_s11, 4096  }
  0x3c   : > { %976 = vsyncadd (%p1222_p0), %s224_s11, 4294963200  ;;  %v843_v0 = vld [vmem:[%s1138_s26 + $0x74] ss:$8 sps:$4 sm:$0xff]   ;;  %v845_v1 = vld [vmem:[%s1138_s26 + $0x70] ss:$8 sps:$4 sm:$0xff]   ;;  %s729_s17 = sshll.u32 %s991_s15, 1  ;;  %v534_v38 = vlaneseq }
  0x3d   : > { %474 = vmatprep.subr.bf16.mxu0 %v843_v0  ;;  %v846_v2 = vld [vmem:[%s1138_s26 + $0x64] ss:$8 sps:$4 sm:$0xff]   ;;  %v848_v3 = vld [vmem:[%s1138_s26 + $0x60] ss:$8 sps:$4 sm:$0xff]   ;;  %v849_v4 = vld [vmem:[%s1138_s26 + $0x54] ss:$8 sps:$4 sm:$0xff]  }
  0x3e   : > { %475 = vmatpush1.bf16.msra.mxu0 %v845_v1  ;;  %v851_v5 = vld [vmem:[%s1138_s26 + $0x50] ss:$8 sps:$4 sm:$0xff]   ;;  %v852_v6 = vld [vmem:[%s1138_s26 + $0x44] ss:$8 sps:$4 sm:$0xff]   ;;  %v854_v7 = vld [vmem:[%s1138_s26 + $0x40] ss:$8 sps:$4 sm:$0xff]  }
  0x3f   : > { %476 = vmatprep.subr.bf16.mxu0 %v846_v2  ;;  %v855_v8 = vld [vmem:[%s1138_s26 + $0x34] ss:$8 sps:$4 sm:$0xff]   ;;  %v857_v9 = vld [vmem:[%s1138_s26 + $0x30] ss:$8 sps:$4 sm:$0xff]   ;;  %v858_v10 = vld [vmem:[%s1138_s26 + $0x24] ss:$8 sps:$4 sm:$0xff]  }
  0x40   : > { %v860_v11 = vld [vmem:[%s1138_s26 + $0x20] ss:$8 sps:$4 sm:$0xff]   ;;  %v861_v12 = vld [vmem:[%s1138_s26 + $0x14] ss:$8 sps:$4 sm:$0xff]   ;;  %v863_v16 = vld [vmem:[%s1138_s26 + $0x10] ss:$8 sps:$4 sm:$0xff]  }
  0x41   : > { %v277_v13 = vld [vmem:[#allocation3 + $0x8] sm:$0xff]  ;;  %v279_v14 = vld [vmem:[#allocation3 + $0x18] sm:$0xff]  ;;  %v276_v35 = vld [vmem:[#allocation3] sm:$0xff]  ;;  %p258_p10 = scmp.lt.s32.totalorder %s729_s17, 3  ;;  %v535_v39 = vshrl.u32 %v534_v38, 7  ;;  %s728_s30 = sshll.u32 %s1134_s8, 4 }
  0x42   : > { %477 = vmatpush1.bf16.msra.mxu0 %v848_v3  ;;  %v281_v15 = vpack.c.bf16 %v279_v14, %v277_v13  ;;  %v864_v17 = vld [vmem:[%s1138_s26 + $0x4] ss:$8 sps:$4 sm:$0xff]   ;;  %v866_v18 = vld [vmem:[%s1138_s26] ss:$8 sps:$4 sm:$0xff]   ;;  %v867_v19 = vld [vmem:[%s1138_s26 + $0xf4] ss:$8 sps:$4 sm:$0xff]  }
  0x43   : > { %478 = vmatprep.subr.bf16.mxu0 %v849_v4  ;;  %v869_v20 = vld [vmem:[%s1138_s26 + $0xf0] ss:$8 sps:$4 sm:$0xff]   ;;  %v870_v21 = vld [vmem:[%s1138_s26 + $0xe4] ss:$8 sps:$4 sm:$0xff]   ;;  %v872_v22 = vld [vmem:[%s1138_s26 + $0xe0] ss:$8 sps:$4 sm:$0xff]  }
  0x44   : > { %506 = vmatprep.mubr.bf16.mxu0 %v281_v15  ;;  %v873_v23 = vld [vmem:[%s1138_s26 + $0xd4] ss:$8 sps:$4 sm:$0xff]   ;;  %v875_v24 = vld [vmem:[%s1138_s26 + $0xd0] ss:$8 sps:$4 sm:$0xff]   ;;  %v876_v25 = vld [vmem:[%s1138_s26 + $0xc4] ss:$8 sps:$4 sm:$0xff]  }
  0x45   : > { %v878_v26 = vld [vmem:[%s1138_s26 + $0xc0] ss:$8 sps:$4 sm:$0xff]   ;;  %v879_v27 = vld [vmem:[%s1138_s26 + $0xb4] ss:$8 sps:$4 sm:$0xff]   ;;  %v881_v28 = vld [vmem:[%s1138_s26 + $0xb0] ss:$8 sps:$4 sm:$0xff]  }
  0x46   : > { %479 = vmatpush1.bf16.msra.mxu0 %v851_v5  ;;  %v882_v29 = vld [vmem:[%s1138_s26 + $0xa4] ss:$8 sps:$4 sm:$0xff]   ;;  %v884_v30 = vld [vmem:[%s1138_s26 + $0xa0] ss:$8 sps:$4 sm:$0xff]   ;;  %v885_v31 = vld [vmem:[%s1138_s26 + $0x94] ss:$8 sps:$4 sm:$0xff]  }
  0x47   : > { %480 = vmatprep.subr.bf16.mxu0 %v852_v6  ;;  %v887_v32 = vld [vmem:[%s1138_s26 + $0x90] ss:$8 sps:$4 sm:$0xff]   ;;  %v888_v33 = vld [vmem:[%s1138_s26 + $0x84] ss:$8 sps:$4 sm:$0xff]   ;;  %v890_v34 = vld [vmem:[%s1138_s26 + $0x80] ss:$8 sps:$4 sm:$0xff]  }
  0x48   : > { %v278_v36 = vld [vmem:[#allocation3 + $0x10] sm:$0xff]  ;;  %s1233_s17 = smov (!%p258_p10, %s729_s17), 3  ;;  %v536_v40 = vsub.s32 0, %v535_v39  ;;  %v540_v41 = vsub.s32 1, %v535_v39  ;;  %s252_s12 = scalar_lea.vmem [#allocation7], %s728_s30 }
  0x49   : > { %v280_v37 = vpack.c.bf16 %v278_v36, %v276_v35  ;;  %s260_s22 = scalar_lea.vmem %s1207_s2, %s1233_s17  ;;  %p1223_p9 = scmp.ne.s32.totalorder %s1216_s21, 0 }
  0x4a   : > { %481 = vmatpush1.bf16.msra.mxu0 %v854_v7  ;;  %v532_v42 = vld [vmem:[%s260_s22] sm:$0x3]  ;;  %s772_s18 = sshll.u32 (%p1223_p9), %s991_s15, 3 }
  0x4b   : > { %482 = vmatprep.subr.bf16.mxu0 %v855_v8  ;;  %v537_v43 = vrot.slane %v532_v42, %v536_v40  ;;  %v541_v44 = vrot.slane %v532_v42, %v540_v41  ;;  %s574_s24 = scalar_lea.vmem (%p1223_p9), %s1208_s3, %s772_s18 }
  0x4e   : > { %483 = vmatpush1.bf16.msra.mxu0 %v857_v9 }
  0x4f   : > { %484 = vmatprep.subr.bf16.mxu0 %v858_v10 }
  0x52   : > { %485 = vmatpush1.bf16.msra.mxu0 %v860_v11 }
  0x53   : > { %486 = vmatprep.subr.bf16.mxu0 %v861_v12 }
  0x56   : > { %487 = vmatpush1.bf16.msra.mxu0 %v863_v16 }
  0x57   : > { %488 = vmatprep.subr.bf16.mxu0 %v864_v17 }
  0x5a   : > { %489 = vmatpush1.bf16.msra.mxu0 %v866_v18 }
  0x5b   : > { %490 = vmatprep.subr.bf16.mxu0 %v867_v19 }
  0x5e   : > { %491 = vmatpush2.bf16.msra.mxu0 %v869_v20 }
  0x5f   : > { %492 = vmatprep.subr.bf16.mxu0 %v870_v21 }
  0x62   : > { %493 = vmatpush2.bf16.msra.mxu0 %v872_v22 }
  0x63   : > { %494 = vmatprep.subr.bf16.mxu0 %v873_v23 }
  0x66   : > { %495 = vmatpush2.bf16.msra.mxu0 %v875_v24 }
  0x67   : > { %496 = vmatprep.subr.bf16.mxu0 %v876_v25 }
  0x6a   : > { %497 = vmatpush2.bf16.msra.mxu0 %v878_v26 }
  0x6b   : > { %498 = vmatprep.subr.bf16.mxu0 %v879_v27 }
  0x6e   : > { %499 = vmatpush2.bf16.msra.mxu0 %v881_v28 }
  0x6f   : > { %500 = vmatprep.subr.bf16.mxu0 %v882_v29 }
  0x72   : > { %501 = vmatpush2.bf16.msra.mxu0 %v884_v30 }
  0x73   : > { %502 = vmatprep.subr.bf16.mxu0 %v885_v31 }
  0x76   : > { %503 = vmatpush2.bf16.msra.mxu0 %v887_v32 }
  0x77   : > { %504 = vmatprep.subr.bf16.mxu0 %v888_v33 }
  0x7a   : > { %505 = vmatpush2.bf16.msra.mxu0 %v890_v34 }
  0x7d   : > { %507 = vmatmul.mubr.bf16.vlgmr.msra.gmra.mxu0 %v280_v37 }
 0x13d   : > { %v508_v45 = vpop.f32.mrf.mxu0 }
 0x13e   : > { %v544_v47 = vadd.f32 %v537_v43, %v508_v45 }
 0x13f   : > { %v510_v46 = vpop.f32.mrf.mxu0 }
 0x140   : > { %v545_v48 = vadd.f32 %v541_v44, %v510_v46 }
 0x141   : > { %v512_v49 = vpop.f32.mrf.mxu0 }
 0x142   : > { %v770_v50 = vpack.c.bf16 %v545_v48, %v544_v47  ;;  %v546_v52 = vadd.f32 %v537_v43, %v512_v49 }
 0x143   : > { %v514_v51 = vpop.f32.mrf.mxu0 }
 0x144   : > { %560 = vst [vmem:[%s252_s12] sm:$0xff] %v770_v50  ;;  %v547_v53 = vadd.f32 %v541_v44, %v514_v51  ;;  %568 = sbr.rel (!%p1223_p9) target bundleno = 337 (0x151), region = 52 }
 0x146   : > { %v771_v54 = vpack.c.bf16 %v547_v53, %v546_v52 }
 0x148   : > { %561 = vst [vmem:[%s252_s12 + $0x8] sm:$0xff] %v771_v54 }
 0x14b   : > { %v605_v55 = vld [vmem:[%s252_s12] sm:$0xff] }
 0x14c   : > { %606 = vst [vmem:[%s574_s24] sm:$0xff] %v605_v55 }
 0x14f   : > { %v607_v56 = vld [vmem:[%s252_s12 + $0x8] sm:$0xff] }
 0x150   : > { %608 = vst [vmem:[%s574_s24 + $0x10] sm:$0xff] %v607_v56 }
 0x151 PF: > { %s1224_s28 = sld [smem:[#allocation10_spill]]  ;;  %s1225_s12 = smov %s983_s13 }
 0x152   : > { %s1226_s13 = smov %s987_s14  ;;  %s1227_s14 = smov %s1120_s25 }
 0x153   : > { %s1228_s15 = smov %s995_s16  ;;  %s1229_s16 = smov %s1231_s27 }
 0x157   : > { %s17_s17 = sadd.s32 1, %s1224_s28  }
 0x158   : > { %p14_p11 = scmp.ge.s32.totalorder %s17_s17, 4  }
 0x15a   :  { %16 = sbr.rel (!%p14_p11) target bundleno = 5 (0x5), region = 127 }
 0x15f   :  { %624 = vsyncpa [#allocation4], 1 }
 0x160   :  { %626 = vsyncpa [#allocation4 + $0x1], 1 }
 0x161   :  { %627 = vsyncpa [#allocation6], 1 }
 0x162   :  { %629 = vsyncpa [#allocation6 + $0x1], 1 }

// kernel: decoder_layer_forward.10
= control target key start
LH: loop header
LB: loop body
LE: loop exit
PB: predicated region body
PF: predicated region fallthrough
CT: control target
= control target key end

     0   :  { %v307_v34 = vlaneseq  ;;  %s653_s1 = inlined_call_operand.vmem [shape: bf16[256,256], index: 1, kind: input, shape index: {}]   ;;  %s654_s0 = inlined_call_operand.vmem [shape: bf16[16,256], index: 0, kind: input, shape index: {}]   ;;  %s655_s3 = inlined_call_operand.vmem [shape: f32[16,256], index: 3, kind: input, shape index: {}]   ;;  %s656_s2 = inlined_call_operand.vmem [shape: f32[1,256], index: 2, kind: input, shape index: {}]   ;;  %s657_s4 = inlined_call_operand.vmem [shape: f32[1,256], index: 4, kind: input, shape index: {}]   ;;  %s658_s5 = inlined_call_operand.vmem [shape: f32[1,256], index: 5, kind: input, shape index: {}]   ;;  %s659_s6 = inlined_call_operand.vmem [shape: f32[16,256], index: 6, kind: output, shape index: {}]  }
   0x1   :  { %v428_v0 = vld [vmem:[%s653_s1 + $0x74] ss:$8 sps:$4 sm:$0xff]   ;;  %v430_v1 = vld [vmem:[%s653_s1 + $0x70] ss:$8 sps:$4 sm:$0xff]   ;;  %v431_v2 = vld [vmem:[%s653_s1 + $0x64] ss:$8 sps:$4 sm:$0xff]  }
   0x2   :  { %239 = vmatprep.subr.bf16.mxu0 %v428_v0  ;;  %v433_v3 = vld [vmem:[%s653_s1 + $0x60] ss:$8 sps:$4 sm:$0xff]   ;;  %v434_v4 = vld [vmem:[%s653_s1 + $0x54] ss:$8 sps:$4 sm:$0xff]   ;;  %v436_v5 = vld [vmem:[%s653_s1 + $0x50] ss:$8 sps:$4 sm:$0xff]  }
   0x3   :  { %240 = vmatpush1.bf16.msra.mxu0 %v430_v1  ;;  %v437_v6 = vld [vmem:[%s653_s1 + $0x44] ss:$8 sps:$4 sm:$0xff]   ;;  %v439_v7 = vld [vmem:[%s653_s1 + $0x40] ss:$8 sps:$4 sm:$0xff]   ;;  %v440_v8 = vld [vmem:[%s653_s1 + $0x34] ss:$8 sps:$4 sm:$0xff]  }
   0x4   :  { %241 = vmatprep.subr.bf16.mxu0 %v431_v2  ;;  %v442_v9 = vld [vmem:[%s653_s1 + $0x30] ss:$8 sps:$4 sm:$0xff]   ;;  %v443_v10 = vld [vmem:[%s653_s1 + $0x24] ss:$8 sps:$4 sm:$0xff]   ;;  %v445_v11 = vld [vmem:[%s653_s1 + $0x20] ss:$8 sps:$4 sm:$0xff]  }
   0x5   :  { %v446_v12 = vld [vmem:[%s653_s1 + $0x14] ss:$8 sps:$4 sm:$0xff]   ;;  %v478_v13 = vld [vmem:[%s654_s0 + $0x4] ss:$8 sps:$4 sm:$0xff]   ;;  %v448_v14 = vld [vmem:[%s653_s1 + $0x10] ss:$8 sps:$4 sm:$0xff]  }
   0x6   :  { %v449_v15 = vld [vmem:[%s653_s1 + $0x4] ss:$8 sps:$4 sm:$0xff]   ;;  %271 = vmatprep.mubr.bf16.mxu0 %v478_v13  ;;  %v451_v16 = vld [vmem:[%s653_s1] ss:$8 sps:$4 sm:$0xff]   ;;  %v452_v17 = vld [vmem:[%s653_s1 + $0xf4] ss:$8 sps:$4 sm:$0xff]  }
   0x7   :  { %242 = vmatpush1.bf16.msra.mxu0 %v433_v3  ;;  %v454_v18 = vld [vmem:[%s653_s1 + $0xf0] ss:$8 sps:$4 sm:$0xff]   ;;  %v455_v19 = vld [vmem:[%s653_s1 + $0xe4] ss:$8 sps:$4 sm:$0xff]   ;;  %v457_v20 = vld [vmem:[%s653_s1 + $0xe0] ss:$8 sps:$4 sm:$0xff]  }
   0x8   :  { %243 = vmatprep.subr.bf16.mxu0 %v434_v4  ;;  %v458_v21 = vld [vmem:[%s653_s1 + $0xd4] ss:$8 sps:$4 sm:$0xff]   ;;  %v460_v22 = vld [vmem:[%s653_s1 + $0xd0] ss:$8 sps:$4 sm:$0xff]   ;;  %v461_v23 = vld [vmem:[%s653_s1 + $0xc4] ss:$8 sps:$4 sm:$0xff]  }
   0x9   :  { %v463_v24 = vld [vmem:[%s653_s1 + $0xc0] ss:$8 sps:$4 sm:$0xff]   ;;  %v464_v25 = vld [vmem:[%s653_s1 + $0xb4] ss:$8 sps:$4 sm:$0xff]   ;;  %v466_v26 = vld [vmem:[%s653_s1 + $0xb0] ss:$8 sps:$4 sm:$0xff]  }
   0xa   :  { %v467_v27 = vld [vmem:[%s653_s1 + $0xa4] ss:$8 sps:$4 sm:$0xff]   ;;  %v469_v28 = vld [vmem:[%s653_s1 + $0xa0] ss:$8 sps:$4 sm:$0xff]   ;;  %v470_v29 = vld [vmem:[%s653_s1 + $0x94] ss:$8 sps:$4 sm:$0xff]  }
   0xb   :  { %244 = vmatpush1.bf16.msra.mxu0 %v436_v5  ;;  %v472_v30 = vld [vmem:[%s653_s1 + $0x90] ss:$8 sps:$4 sm:$0xff]   ;;  %v473_v31 = vld [vmem:[%s653_s1 + $0x84] ss:$8 sps:$4 sm:$0xff]   ;;  %v475_v32 = vld [vmem:[%s653_s1 + $0x80] ss:$8 sps:$4 sm:$0xff]  }
   0xc   :  { %245 = vmatprep.subr.bf16.mxu0 %v437_v6  ;;  %v476_v33 = vld [vmem:[%s654_s0] ss:$8 sps:$4 sm:$0xff]   ;;  %v308_v35 = vshrl.u32 %v307_v34, 7  ;;  %v295_v46 = vld [vmem:[%s655_s3 + $0x10] sm:$0xff]  ;;  %v296_v49 = vld [vmem:[%s655_s3 + $0x18] sm:$0xff] }
   0xd   :  { %v293_v38 = vld [vmem:[%s655_s3] sm:$0xff]  ;;  %v294_v41 = vld [vmem:[%s655_s3 + $0x8] sm:$0xff] }
   0xe   :  { %v309_v36 = vsub.s32 0, %v308_v35  ;;  %v313_v37 = vsub.s32 1, %v308_v35  ;;  %v305_v39 = vld [vmem:[%s656_s2] sm:$0x3] }
   0xf   :  { %246 = vmatpush1.bf16.msra.mxu0 %v439_v7 }
  0x10   :  { %247 = vmatprep.subr.bf16.mxu0 %v440_v8  ;;  %v310_v43 = vrot.slane %v305_v39, %v309_v36  ;;  %v314_v44 = vrot.slane %v305_v39, %v313_v37 }
  0x13   :  { %248 = vmatpush1.bf16.msra.mxu0 %v442_v9 }
  0x14   :  { %249 = vmatprep.subr.bf16.mxu0 %v443_v10 }
  0x17   :  { %250 = vmatpush1.bf16.msra.mxu0 %v445_v11 }
  0x18   :  { %251 = vmatprep.subr.bf16.mxu0 %v446_v12 }
  0x1b   :  { %252 = vmatpush1.bf16.msra.mxu0 %v448_v14 }
  0x1c   :  { %253 = vmatprep.subr.bf16.mxu0 %v449_v15  ;;  %v354_v15 = vld [vmem:[%s657_s4] sm:$0x3] }
  0x1f   :  { %254 = vmatpush1.bf16.msra.mxu0 %v451_v16  ;;  %v370_v16 = vld [vmem:[%s658_s5] sm:$0x3] }
  0x20   :  { %255 = vmatprep.subr.bf16.mxu0 %v452_v17  ;;  %v359_v17 = vrot.slane %v354_v15, %v309_v36 }
  0x23   :  { %256 = vmatpush2.bf16.msra.mxu0 %v454_v18  ;;  %v363_v18 = vrot.slane %v354_v15, %v313_v37 }
  0x24   :  { %257 = vmatprep.subr.bf16.mxu0 %v455_v19 }
  0x27   :  { %258 = vmatpush2.bf16.msra.mxu0 %v457_v20  ;;  %v375_v20 = vrot.slane %v370_v16, %v309_v36 }
  0x28   :  { %259 = vmatprep.subr.bf16.mxu0 %v458_v21  ;;  %v379_v21 = vrot.slane %v370_v16, %v313_v37 }
  0x2b   :  { %260 = vmatpush2.bf16.msra.mxu0 %v460_v22 }
  0x2c   :  { %261 = vmatprep.subr.bf16.mxu0 %v461_v23 }
  0x2f   :  { %262 = vmatpush2.bf16.msra.mxu0 %v463_v24 }
  0x30   :  { %263 = vmatprep.subr.bf16.mxu0 %v464_v25 }
  0x33   :  { %264 = vmatpush2.bf16.msra.mxu0 %v466_v26 }
  0x34   :  { %265 = vmatprep.subr.bf16.mxu0 %v467_v27 }
  0x37   :  { %266 = vmatpush2.bf16.msra.mxu0 %v469_v28 }
  0x38   :  { %267 = vmatprep.subr.bf16.mxu0 %v470_v29 }
  0x3b   :  { %268 = vmatpush2.bf16.msra.mxu0 %v472_v30 }
  0x3c   :  { %269 = vmatprep.subr.bf16.mxu0 %v473_v31 }
  0x3f   :  { %270 = vmatpush2.bf16.msra.mxu0 %v475_v32 }
  0x42   :  { %272 = vmatmul.mubr.bf16.vlgmr.msra.gmra.mxu0 %v476_v33 }
 0x102   :  { %v273_v40 = vpop.f32.mrf.mxu0 }
 0x103   :  { %v301_v42 = vadd.f32 %v293_v38, %v273_v40 }
 0x104   :  { %v275_v45 = vpop.f32.mrf.mxu0 }
 0x105   :  { %v302_v47 = vadd.f32 %v294_v41, %v275_v45  ;;  %v317_v51 = vadd.f32 %v310_v43, %v301_v42 }
 0x106   :  { %v277_v48 = vpop.f32.mrf.mxu0 }
 0x107   :  { %v303_v50 = vadd.f32 %v295_v46, %v277_v48  ;;  %v318_v52 = vadd.f32 %v314_v44, %v302_v47 }
 0x108   :  { %v279_v53 = vpop.f32.mrf.mxu0 }
 0x109   :  { %v304_v54 = vadd.f32 %v296_v49, %v279_v53  ;;  %v321_v55 = vadd.f32 %v318_v52, %v317_v51  ;;  %v319_v56 = vadd.f32 %v310_v43, %v303_v50 }
 0x10b   :  { %v320_v57 = vadd.f32 %v314_v44, %v304_v54  ;;  %322 = vadd.xlane.f32.xlu0 %v321_v55 }
 0x10d   :  { %v324_v58 = vadd.f32 %v320_v57, %v319_v56 }
 0x10f   :  { %325 = vadd.xlane.f32.xlu0 %v324_v58 }
 0x194   :  { %v323_v59 = vpop.xlane.xlu0 %322 }
 0x195   :  { %v328_v60 = vmul.f32 0.00390625, %v323_v59 }
 0x197   :  { %v330_v61 = vsub.f32 %v317_v51, %v328_v60  ;;  %v331_v62 = vsub.f32 %v318_v52, %v328_v60 }
 0x198   :  { %v326_v63 = vpop.xlane.xlu0 %325 }
 0x199   :  { %v329_v0 = vmul.f32 0.00390625, %v326_v63  ;;  %v334_v1 = vmul.f32 %v330_v61, %v330_v61  ;;  %v335_v2 = vmul.f32 %v331_v62, %v331_v62 }
 0x19b   :  { %v332_v3 = vsub.f32 %v319_v56, %v329_v0  ;;  %v333_v4 = vsub.f32 %v320_v57, %v329_v0  ;;  %v338_v5 = vadd.f32 %v335_v2, %v334_v1 }
 0x19d   :  { %339 = vadd.xlane.f32.xlu1 %v338_v5  ;;  %v336_v6 = vmul.f32 %v332_v3, %v332_v3  ;;  %v337_v7 = vmul.f32 %v333_v4, %v333_v4 }
 0x19f   :  { %v341_v8 = vadd.f32 %v337_v7, %v336_v6 }
 0x1a1   :  { %342 = vadd.xlane.f32.xlu1 %v341_v8 }
 0x226   :  { %v340_v9 = vpop.xlane.xlu1 %339 }
 0x227   :  { %v344_v10 = vmul.f32 0.00390625, %v340_v9 }
 0x229   :  { %v346_v11 = vadd.f32 1e-05, %v344_v10 }
 0x22a   :  { %v343_v12 = vpop.xlane.xlu1 %342 }
 0x22b   :  { %479 = vrsqrt.f32 %v346_v11  ;;  %v345_v13 = vmul.f32 0.00390625, %v343_v12 }
 0x22d   :  { %v347_v14 = vadd.f32 1e-05, %v345_v13 }
 0x22f   :  { %481 = vrsqrt.f32 %v347_v14 }
 0x238   :  { %v480_v19 = vpop.eup %479 }
 0x239   :  { %v350_v22 = vmul.f32 %v480_v19, %v330_v61  ;;  %v351_v23 = vmul.f32 %v480_v19, %v331_v62 }
 0x23b   :  { %v366_v24 = vmul.f32 %v359_v17, %v350_v22  ;;  %v367_v25 = vmul.f32 %v363_v18, %v351_v23 }
 0x23c   :  { %v482_v26 = vpop.eup %481 }
 0x23d   :  { %v382_v27 = vadd.f32 %v375_v20, %v366_v24  ;;  %v383_v28 = vadd.f32 %v379_v21, %v367_v25  ;;  %v352_v29 = vmul.f32 %v482_v26, %v332_v3  ;;  %v353_v30 = vmul.f32 %v482_v26, %v333_v4 }
 0x23f   :  { %386 = vst [vmem:[%s659_s6] sm:$0xff] %v382_v27  ;;  %387 = vst [vmem:[%s659_s6 + $0x8] sm:$0xff] %v383_v28  ;;  %v368_v31 = vmul.f32 %v359_v17, %v352_v29  ;;  %v369_v32 = vmul.f32 %v363_v18, %v353_v30 }
 0x241   :  { %v384_v33 = vadd.f32 %v375_v20, %v368_v31  ;;  %v385_v34 = vadd.f32 %v379_v21, %v369_v32 }
 0x243   :  { %388 = vst [vmem:[%s659_s6 + $0x10] sm:$0xff] %v384_v33  ;;  %389 = vst [vmem:[%s659_s6 + $0x18] sm:$0xff] %v385_v34 }

// kernel: decoder_layer_forward.11
= control target key start
LH: loop header
LB: loop body
LE: loop exit
PB: predicated region body
PF: predicated region fallthrough
CT: control target
= control target key end

     0   :  { %v284_v38 = vlaneseq  ;;  %s537_s1 = inlined_call_operand.vmem [shape: bf16[256,256], index: 1, kind: input, shape index: {}]   ;;  %s538_s0 = inlined_call_operand.vmem [shape: f32[16,256], index: 0, kind: input, shape index: {}]   ;;  %s539_s2 = inlined_call_operand.vmem [shape: f32[1,256], index: 2, kind: input, shape index: {}]   ;;  %s540_s3 = inlined_call_operand.vmem [shape: bf16[16,256], index: 3, kind: output, shape index: {}]  }
   0x1   :  { %v352_v0 = vld [vmem:[%s537_s1 + $0x74] ss:$8 sps:$4 sm:$0xff]   ;;  %v354_v1 = vld [vmem:[%s537_s1 + $0x70] ss:$8 sps:$4 sm:$0xff]   ;;  %v355_v2 = vld [vmem:[%s537_s1 + $0x64] ss:$8 sps:$4 sm:$0xff]  }
   0x2   :  { %224 = vmatprep.subr.bf16.mxu0 %v352_v0  ;;  %v357_v3 = vld [vmem:[%s537_s1 + $0x60] ss:$8 sps:$4 sm:$0xff]   ;;  %v358_v4 = vld [vmem:[%s537_s1 + $0x54] ss:$8 sps:$4 sm:$0xff]   ;;  %v360_v5 = vld [vmem:[%s537_s1 + $0x50] ss:$8 sps:$4 sm:$0xff]  }
   0x3   :  { %225 = vmatpush1.bf16.msra.mxu0 %v354_v1  ;;  %v361_v6 = vld [vmem:[%s537_s1 + $0x44] ss:$8 sps:$4 sm:$0xff]   ;;  %v363_v7 = vld [vmem:[%s537_s1 + $0x40] ss:$8 sps:$4 sm:$0xff]   ;;  %v364_v8 = vld [vmem:[%s537_s1 + $0x34] ss:$8 sps:$4 sm:$0xff]  }
   0x4   :  { %226 = vmatprep.subr.bf16.mxu0 %v355_v2  ;;  %v366_v9 = vld [vmem:[%s537_s1 + $0x30] ss:$8 sps:$4 sm:$0xff]   ;;  %v367_v10 = vld [vmem:[%s537_s1 + $0x24] ss:$8 sps:$4 sm:$0xff]   ;;  %v369_v11 = vld [vmem:[%s537_s1 + $0x20] ss:$8 sps:$4 sm:$0xff]  }
   0x5   :  { %v370_v12 = vld [vmem:[%s537_s1 + $0x14] ss:$8 sps:$4 sm:$0xff]   ;;  %v27_v13 = vld [vmem:[%s538_s0 + $0x8] sm:$0xff]  ;;  %v372_v16 = vld [vmem:[%s537_s1 + $0x10] ss:$8 sps:$4 sm:$0xff]   ;;  %v285_v39 = vshrl.u32 %v284_v38, 7 }
   0x6   :  { %v29_v14 = vld [vmem:[%s538_s0 + $0x18] sm:$0xff]  ;;  %v373_v17 = vld [vmem:[%s537_s1 + $0x4] ss:$8 sps:$4 sm:$0xff]   ;;  %v375_v18 = vld [vmem:[%s537_s1] ss:$8 sps:$4 sm:$0xff]  }
   0x7   :  { %227 = vmatpush1.bf16.msra.mxu0 %v357_v3  ;;  %v31_v15 = vpack.c.bf16 %v29_v14, %v27_v13  ;;  %v376_v19 = vld [vmem:[%s537_s1 + $0xf4] ss:$8 sps:$4 sm:$0xff]   ;;  %v378_v20 = vld [vmem:[%s537_s1 + $0xf0] ss:$8 sps:$4 sm:$0xff]   ;;  %v379_v21 = vld [vmem:[%s537_s1 + $0xe4] ss:$8 sps:$4 sm:$0xff]  }
   0x8   :  { %228 = vmatprep.subr.bf16.mxu0 %v358_v4  ;;  %v381_v22 = vld [vmem:[%s537_s1 + $0xe0] ss:$8 sps:$4 sm:$0xff]   ;;  %v382_v23 = vld [vmem:[%s537_s1 + $0xd4] ss:$8 sps:$4 sm:$0xff]   ;;  %v384_v24 = vld [vmem:[%s537_s1 + $0xd0] ss:$8 sps:$4 sm:$0xff]  }
   0x9   :  { %256 = vmatprep.mubr.bf16.mxu0 %v31_v15  ;;  %v385_v25 = vld [vmem:[%s537_s1 + $0xc4] ss:$8 sps:$4 sm:$0xff]   ;;  %v387_v26 = vld [vmem:[%s537_s1 + $0xc0] ss:$8 sps:$4 sm:$0xff]   ;;  %v388_v27 = vld [vmem:[%s537_s1 + $0xb4] ss:$8 sps:$4 sm:$0xff]  }
   0xa   :  { %v390_v28 = vld [vmem:[%s537_s1 + $0xb0] ss:$8 sps:$4 sm:$0xff]   ;;  %v391_v29 = vld [vmem:[%s537_s1 + $0xa4] ss:$8 sps:$4 sm:$0xff]   ;;  %v393_v30 = vld [vmem:[%s537_s1 + $0xa0] ss:$8 sps:$4 sm:$0xff]  }
   0xb   :  { %229 = vmatpush1.bf16.msra.mxu0 %v360_v5  ;;  %v394_v31 = vld [vmem:[%s537_s1 + $0x94] ss:$8 sps:$4 sm:$0xff]   ;;  %v396_v32 = vld [vmem:[%s537_s1 + $0x90] ss:$8 sps:$4 sm:$0xff]   ;;  %v397_v33 = vld [vmem:[%s537_s1 + $0x84] ss:$8 sps:$4 sm:$0xff]  }
   0xc   :  { %230 = vmatprep.subr.bf16.mxu0 %v361_v6  ;;  %v399_v34 = vld [vmem:[%s537_s1 + $0x80] ss:$8 sps:$4 sm:$0xff]   ;;  %v28_v36 = vld [vmem:[%s538_s0 + $0x10] sm:$0xff]  ;;  %v286_v40 = vsub.s32 0, %v285_v39  ;;  %v290_v41 = vsub.s32 1, %v285_v39 }
   0xd   :  { %v26_v35 = vld [vmem:[%s538_s0] sm:$0xff] }
   0xe   :  { %v30_v37 = vpack.c.bf16 %v28_v36, %v26_v35  ;;  %v282_v42 = vld [vmem:[%s539_s2] sm:$0x3] }
   0xf   :  { %231 = vmatpush1.bf16.msra.mxu0 %v363_v7  ;;  %v287_v43 = vrot.slane %v282_v42, %v286_v40  ;;  %v291_v44 = vrot.slane %v282_v42, %v290_v41 }
  0x10   :  { %232 = vmatprep.subr.bf16.mxu0 %v364_v8 }
  0x13   :  { %233 = vmatpush1.bf16.msra.mxu0 %v366_v9 }
  0x14   :  { %234 = vmatprep.subr.bf16.mxu0 %v367_v10 }
  0x17   :  { %235 = vmatpush1.bf16.msra.mxu0 %v369_v11 }
  0x18   :  { %236 = vmatprep.subr.bf16.mxu0 %v370_v12 }
  0x1b   :  { %237 = vmatpush1.bf16.msra.mxu0 %v372_v16 }
  0x1c   :  { %238 = vmatprep.subr.bf16.mxu0 %v373_v17 }
  0x1f   :  { %239 = vmatpush1.bf16.msra.mxu0 %v375_v18 }
  0x20   :  { %240 = vmatprep.subr.bf16.mxu0 %v376_v19 }
  0x23   :  { %241 = vmatpush2.bf16.msra.mxu0 %v378_v20 }
  0x24   :  { %242 = vmatprep.subr.bf16.mxu0 %v379_v21 }
  0x27   :  { %243 = vmatpush2.bf16.msra.mxu0 %v381_v22 }
  0x28   :  { %244 = vmatprep.subr.bf16.mxu0 %v382_v23 }
  0x2b   :  { %245 = vmatpush2.bf16.msra.mxu0 %v384_v24 }
  0x2c   :  { %246 = vmatprep.subr.bf16.mxu0 %v385_v25 }
  0x2f   :  { %247 = vmatpush2.bf16.msra.mxu0 %v387_v26 }
  0x30   :  { %248 = vmatprep.subr.bf16.mxu0 %v388_v27 }
  0x33   :  { %249 = vmatpush2.bf16.msra.mxu0 %v390_v28 }
  0x34   :  { %250 = vmatprep.subr.bf16.mxu0 %v391_v29 }
  0x37   :  { %251 = vmatpush2.bf16.msra.mxu0 %v393_v30 }
  0x38   :  { %252 = vmatprep.subr.bf16.mxu0 %v394_v31 }
  0x3b   :  { %253 = vmatpush2.bf16.msra.mxu0 %v396_v32 }
  0x3c   :  { %254 = vmatprep.subr.bf16.mxu0 %v397_v33 }
  0x3f   :  { %255 = vmatpush2.bf16.msra.mxu0 %v399_v34 }
  0x42   :  { %257 = vmatmul.mubr.bf16.vlgmr.msra.gmra.mxu0 %v30_v37 }
 0x102   :  { %v258_v45 = vpop.f32.mrf.mxu0 }
 0x103   :  { %v294_v47 = vadd.f32 %v287_v43, %v258_v45 }
 0x104   :  { %v260_v46 = vpop.f32.mrf.mxu0 }
 0x105   :  { %v295_v48 = vadd.f32 %v291_v44, %v260_v46 }
 0x106   :  { %v262_v49 = vpop.f32.mrf.mxu0 }
 0x107   :  { %v350_v50 = vpack.c.bf16 %v295_v48, %v294_v47  ;;  %v296_v52 = vadd.f32 %v287_v43, %v262_v49 }
 0x108   :  { %v264_v51 = vpop.f32.mrf.mxu0 }
 0x109   :  { %310 = vst [vmem:[%s540_s3] sm:$0xff] %v350_v50  ;;  %v297_v53 = vadd.f32 %v291_v44, %v264_v51 }
 0x10b   :  { %v351_v54 = vpack.c.bf16 %v297_v53, %v296_v52 }
 0x10d   :  { %311 = vst [vmem:[%s540_s3 + $0x8] sm:$0xff] %v351_v54 }

// kernel: decoder_layer_forward.13
= control target key start
LH: loop header
LB: loop body
LE: loop exit
PB: predicated region body
PF: predicated region fallthrough
CT: control target
= control target key end

     0   :  { %s640_s12 = smov 0   ;;  %s642_s13 = smov 0   ;;  %s722_s0 = inlined_call_operand.vmem [shape: bf16[2,8,256], index: 0, kind: input, shape index: {}]   ;;  %s723_s1 = inlined_call_operand.vmem [shape: bf16[2,8,512], index: 1, kind: input, shape index: {}, may-alias: {1,2}]   ;;  %s724_s2 = inlined_call_operand.vmem [shape: bf16[2,8,512], index: 2, kind: input, shape index: {}, may-alias: {1,2}]   ;;  %s725_s3 = inlined_call_operand.vmem [shape: bf16[2,2,8,128], index: 3, kind: output, shape index: {}]  }
   0x1   :  { %s644_s14 = smov 0   ;;  %s646_s15 = smov 0  }
   0x2   :  { %s648_s16 = smov 0  }
   0x3 LB: > { %s22_s17 = sadd.s32 1, %s608_s14  ;;  %s25_s18 = sadd.s32 1, %s612_s15  ;;  %s616_s16 = sphi %s648_s16, %s13_s16   ;;  %s612_s15 = sphi %s646_s15, %s729_s15   ;;  %s608_s14 = sphi %s644_s14, %s728_s14   ;;  %s604_s13 = sphi %s642_s13, %s727_s13   ;;  %s600_s12 = sphi %s640_s12, %s726_s12  }
   0x4   : > { %p23_p0 = scmp.ge.s32.totalorder %s22_s17, 2  ;;  %p504_p1 = scmp.ge.s32.totalorder %s616_s16, 1 }
   0x5   : > { %p190_p2 = scmp.lt.s32.totalorder %s616_s16, 5 }
   0x6   : > { %s731_s17 = smov (%p23_p0, %s22_s17), 0  ;;  %s733_s18 = smov (!%p23_p0, %s25_s18), %s612_s15 }
   0x7   : > { %p191_p3 = pnand %p504_p1, %p190_p2  ;;  %p27_p4 = scmp.ge.s32.totalorder %s733_s18, 2 }
   0x8   : > { %p237_p5 = scmp.lt.s32.totalorder (!%p191_p3), %s604_s13, 1  ;;  %p247_p6 = scmp.lt.s32.totalorder (!%p191_p3), %s600_s12, 3 }
   0x9   : > { %s735_s18 = smov (%p27_p4, %s733_s18), 0  ;;  %194 = sbr.rel (%p191_p3) target bundleno = 736 (0x2e0), region = 32 }
   0xa   : > { %p239_p7 = scmp.lt.s32.totalorder (!%p191_p3), %s600_s12, 1  ;;  %s253_s6 = sadd.s32 (!%p191_p3), 2, %s600_s12 }
   0xb   : > { %p256_p8 = scmp.lt.s32.totalorder (!%p191_p3), %s253_s6, 3 }
   0xe   : > { %v618_v0 = vmov 0.0   ;;  %vm619_vm0 = vmmov 0   ;;  %s737_s13 = smov (!%p237_p5, %s604_s13), 1  ;;  %vm316_vm1 = vcmask 64512   ;;  %s739_s6 = smov (!%p256_p8, %s253_s6), 3  ;;  %vm332_vm2 = vcmask 1043456  }
   0xf   : > { %520 = vmatprep.subr.bf16.mxu0 %v618_v0  ;;  %522 = vmatprep.mubr.msk.bf16.mxu0 %vm619_vm0, %v618_v0  ;;  %s248_s19 = scalar_select %p247_p6, %s600_s12, 3 }
  0x10   : > { %526 = vmatprep.subr.bf16.mxu1 %v618_v0  ;;  %528 = vmatprep.mubr.msk.bf16.mxu1 %vm619_vm0, %v618_v0  ;;  %s507_s20 = sshll.u32 %s737_s13, 2  ;;  %s505_s26 = sshll.u32 %s737_s13, 1 }
  0x11   : > { %s250_s21 = sadd.s32 %s507_s20, %s248_s19  ;;  %s259_s7 = sadd.s32 %s507_s20, %s739_s6 }
  0x12   : > { %s508_s22 = sshll.u32 %s250_s21, 2  ;;  %s510_s8 = sshll.u32 %s259_s7, 2 }
  0x13   : > { %s252_s25 = scalar_lea.vmem %s723_s1, %s508_s22  ;;  %s261_s11 = scalar_lea.vmem %s724_s2, %s510_s8 }
  0x14   : > { %v273_v1 = vld [vmem:[%s252_s25] sm:$0xf]  ;;  %s240_s27 = scalar_select %p239_p7, %s600_s12, 1 }
  0x15   : > { %521 = vmatpush3.bf16.xpose.msra.mxu0 %v273_v1  ;;  %v274_v14 = vld [vmem:[%s261_s11] sm:$0xf] }
  0x16   : > { %s685_s28 = sadd.s32 %s505_s26, %s240_s27  ;;  %v334_v15 = vsel %vm332_vm2, %v274_v14, 0 }
  0x17   : > { %s506_s29 = sshll.u32 %s685_s28, 2  ;;  %527 = vmatpush3.bf16.msra.mxu1 %v334_v15 }
  0x18   : > { %s244_s5 = scalar_lea.vmem %s722_s0, %s506_s29  ;;  %s270_s19 = scalar_lea.vmem %s725_s3, %s506_s29 }
  0x19   : > { %v272_v2 = vld [vmem:[%s244_s5] sm:$0xf] }
  0x1c   : > { %523 = vmatmul.mubr.bf16.vlgmr.msra.gmra.mxu0 %v272_v2 }
  0xdc   : > { %v309_v3 = vpop.f32.mrf.mxu0 }
  0xdd   : > { %v315_v4 = vmul.f32 0.088388346, %v309_v3 }
  0xde   : > { %v524_v5 = vpop.f32.mrf.mxu0 }
  0xdf   : > { %v317_v6 = vsel %vm316_vm1, %v315_v4, -inf }
  0xe0   : > { %318 = vmax.xlane.f32.xlu0 %v317_v6  ;;  %v312_v7 = vpop.f32.mrf.mxu0 }
  0xe2   : > { %v525_v8 = vpop.f32.mrf.mxu0 }
 0x169   : > { %v319_v9 = vpop.xlane.xlu0 %318 }
 0x16a   : > { %v320_v10 = vsub.f32 %v315_v4, %v319_v9 }
 0x16c   : > { %v321_v11 = vmul.f32 1.442695, %v320_v10 }
 0x16e   : > { %574 = vpow2.f32 %v321_v11 }
 0x17b   : > { %v575_v12 = vpop.eup %574 }
 0x17c   : > { %v323_v13 = vsel %vm316_vm1, %v575_v12, 0.0 }
 0x17d   : > { %324 = vadd.xlane.f32.xlu0 %v323_v13 }
 0x206   : > { %v325_v16 = vpop.xlane.xlu0 %324 }
 0x207   : > { %576 = vrcp.f32 %v325_v16 }
 0x214   : > { %v577_v17 = vpop.eup %576 }
 0x215   : > { %v327_v18 = vmul.f32 %v577_v17, %v575_v12 }
 0x217   : > { %v328_v19 = vpack.c.bf16 %v327_v18, %v327_v18 }
 0x219   : > { %529 = vmatmul.mubr.msk.bf16.vlgmr.msra.gmra.mxu1 %vm316_vm1, %v328_v19 }
 0x2d9   : > { %v370_v20 = vpop.f32.mrf.mxu1 }
 0x2da   : > { %v376_v21 = vpack.c.bf16 %v370_v20, %v370_v20 }
 0x2db   : > { %v530_v22 = vpop.f32.mrf.mxu1 }
 0x2dc   : > { %377 = vst [vmem:[%s270_s19] sm:$0xf] %v376_v21 }
 0x2dd   : > { %v373_v23 = vpop.f32.mrf.mxu1 }
 0x2df   : > { %v531_v24 = vpop.f32.mrf.mxu1 }
 0x2e0 PF: > { %s13_s16 = sadd.s32 1, %s616_s16   ;;  %s726_s12 = smov %s608_s14 }
 0x2e1   : > { %p10_p9 = scmp.ge.s32.totalorder %s13_s16, 6   ;;  %s727_s13 = smov %s612_s15 }
 0x2e2   : > { %s728_s14 = smov %s731_s17  ;;  %s729_s15 = smov %s735_s18 }
 0x2e3   :  { %12 = sbr.rel (!%p10_p9) target bundleno = 3 (0x3), region = 68 }

// kernel: decoder_layer_forward.15
= control target key start
LH: loop header
LB: loop body
LE: loop exit
PB: predicated region body
PF: predicated region fallthrough
CT: control target
= control target key end

     0   :  { %12 = vsyncpa [#allocation5], 0  ;;  %s1588_s24 = smov 0   ;;  %s1590_s25 = smov 0   ;;  %s1866_s0 = inlined_call_operand.vmem [shape: f32[16,256], index: 0, kind: input, shape index: {}]   ;;  %s1867_s1 = inlined_call_operand.vmem [shape: bf16[256,512], index: 1, kind: input, shape index: {}]   ;;  %s1868_s2 = inlined_call_operand.vmem [shape: f32[1,512], index: 2, kind: input, shape index: {}]   ;;  %s1869_s3 = inlined_call_operand.vmem [shape: bf16[512,256], index: 3, kind: input, shape index: {}]   ;;  %s1870_s4 = inlined_call_operand.vmem [shape: f32[1,256], index: 4, kind: input, shape index: {}]   ;;  %s1871_s5 = inlined_call_operand.vmem [shape: f32[1,256], index: 5, kind: input, shape index: {}]   ;;  %s1872_s6 = inlined_call_operand.vmem [shape: f32[1,256], index: 6, kind: input, shape index: {}]   ;;  %s1873_s7 = inlined_call_operand.hbm [shape: f32[16,256], index: 7, kind: output, shape index: {}]  }
   0x1   :  { %s1592_s26 = smov 0   ;;  %s1594_s27 = smov 0  }
   0x2   :  { %s1596_s28 = smov 0  }
   0x3 LB: > { %s1233_s29 = sadd.s32 4294967295, %s1542_s28   ;;  %s27_s30 = sadd.s32 1, %s1538_s27  ;;  %s1542_s28 = sphi %s1596_s28, %s18_s28   ;;  %s1538_s27 = sphi %s1594_s27, %s1878_s27   ;;  %s1534_s26 = sphi %s1592_s26, %s1877_s26   ;;  %s1530_s25 = sphi %s1590_s25, %s1876_s25   ;;  %s1526_s24 = sphi %s1588_s24, %s1875_s24  }
   0x4   : > { %p28_p0 = scmp.ge.s32.totalorder %s27_s30, 2  ;;  %p70_p1 = scmp.ne.s32.totalorder %s1530_s25, %s1526_s24 }
   0x5   : > { %p71_p2 = scmp.eq.s32.totalorder %s1542_s28, 0  ;;  %s63_s9 = sadd.s32 1, %s1530_s25 }
   0x6   : > { %s1880_s30 = smov (%p28_p0, %s27_s30), 0  ;;  %p1236_p5 = scmp.ge.s32.totalorder %s1542_s28, 2 }
   0x7   : > { %p72_p3 = por %p71_p2, %p70_p1  ;;  %s60_s8 = ssub.s32 %s1538_s27, %s1880_s30 }
   0x8   : > { %p61_p4 = scmp.eq.s32.totalorder %s60_s8, 0  ;;  %256 = sbr.rel (%p1236_p5) target bundleno = 33 (0x21), region = 32 }
   0xa   : > { %s1624_s10 = scalar_select %p61_p4, %s1530_s25, %s63_s9  }
   0xd   : > { %259 = sbr.rel (!%p72_p3) target bundleno = 33 (0x21), region = 36  ;;  %s261_s11 = sand.u32 (%p72_p3), 1, %s1530_s25  }
   0xe   : > { %s1316_s12 = sshll.u32 (%p72_p3), %s1538_s27, 3  ;;  %s1237_s13 = sshll.u32 (%p72_p3), %s261_s11, 8 }
   0xf   : > { %s1632_s16 = scalar_lea.vmem (%p72_p3), %s1867_s1, %s1316_s12  ;;  %s1637_s17 = scalar_lea.vmem (%p72_p3), [#allocation3], %s1237_s13 }
  0x10   : > { %v357_v0 = vld [vmem:[%s1632_s16] sm:$0xff] (%p72_p3)  ;;  %v359_v1 = vld [vmem:[%s1632_s16 + $0x10] sm:$0xff] (%p72_p3) }
  0x11   : > { %v361_v2 = vld [vmem:[%s1632_s16 + $0x20] sm:$0xff] (%p72_p3)  ;;  %358 = vst [vmem:[%s1637_s17] sm:$0xff] (%p72_p3), %v357_v0  ;;  %360 = vst [vmem:[%s1637_s17 + $0x8] sm:$0xff] (%p72_p3), %v359_v1  ;;  %v363_v3 = vld [vmem:[%s1632_s16 + $0x30] sm:$0xff] (%p72_p3) }
  0x12   : > { %362 = vst [vmem:[%s1637_s17 + $0x10] sm:$0xff] %v361_v2  ;;  %v365_v4 = vld [vmem:[%s1632_s16 + $0x40] sm:$0xff]  ;;  %v367_v5 = vld [vmem:[%s1632_s16 + $0x50] sm:$0xff]  ;;  %364 = vst [vmem:[%s1637_s17 + $0x18] sm:$0xff] %v363_v3 }
  0x13   : > { %366 = vst [vmem:[%s1637_s17 + $0x20] sm:$0xff] %v365_v4  ;;  %368 = vst [vmem:[%s1637_s17 + $0x28] sm:$0xff] %v367_v5  ;;  %v369_v6 = vld [vmem:[%s1632_s16 + $0x60] sm:$0xff]  ;;  %v371_v7 = vld [vmem:[%s1632_s16 + $0x70] sm:$0xff] }
  0x14   : > { %v373_v8 = vld [vmem:[%s1632_s16 + $0x80] sm:$0xff]  ;;  %370 = vst [vmem:[%s1637_s17 + $0x30] sm:$0xff] %v369_v6  ;;  %372 = vst [vmem:[%s1637_s17 + $0x38] sm:$0xff] %v371_v7  ;;  %v375_v9 = vld [vmem:[%s1632_s16 + $0x90] sm:$0xff] }
  0x15   : > { %374 = vst [vmem:[%s1637_s17 + $0x40] sm:$0xff] %v373_v8  ;;  %v377_v10 = vld [vmem:[%s1632_s16 + $0xa0] sm:$0xff]  ;;  %v379_v11 = vld [vmem:[%s1632_s16 + $0xb0] sm:$0xff]  ;;  %376 = vst [vmem:[%s1637_s17 + $0x48] sm:$0xff] %v375_v9 }
  0x16   : > { %378 = vst [vmem:[%s1637_s17 + $0x50] sm:$0xff] %v377_v10  ;;  %380 = vst [vmem:[%s1637_s17 + $0x58] sm:$0xff] %v379_v11  ;;  %v381_v12 = vld [vmem:[%s1632_s16 + $0xc0] sm:$0xff]  ;;  %v383_v13 = vld [vmem:[%s1632_s16 + $0xd0] sm:$0xff] }
  0x17   : > { %v385_v14 = vld [vmem:[%s1632_s16 + $0xe0] sm:$0xff]  ;;  %382 = vst [vmem:[%s1637_s17 + $0x60] sm:$0xff] %v381_v12  ;;  %384 = vst [vmem:[%s1637_s17 + $0x68] sm:$0xff] %v383_v13  ;;  %v387_v15 = vld [vmem:[%s1632_s16 + $0xf0] sm:$0xff] }
  0x18   : > { %386 = vst [vmem:[%s1637_s17 + $0x70] sm:$0xff] %v385_v14  ;;  %v389_v16 = vld [vmem:[%s1632_s16 + $0x100] sm:$0xff]  ;;  %v391_v17 = vld [vmem:[%s1632_s16 + $0x110] sm:$0xff]  ;;  %388 = vst [vmem:[%s1637_s17 + $0x78] sm:$0xff] %v387_v15 }
  0x19   : > { %390 = vst [vmem:[%s1637_s17 + $0x80] sm:$0xff] %v389_v16  ;;  %392 = vst [vmem:[%s1637_s17 + $0x88] sm:$0xff] %v391_v17  ;;  %v393_v18 = vld [vmem:[%s1632_s16 + $0x120] sm:$0xff]  ;;  %v395_v19 = vld [vmem:[%s1632_s16 + $0x130] sm:$0xff] }
  0x1a   : > { %v397_v20 = vld [vmem:[%s1632_s16 + $0x140] sm:$0xff]  ;;  %394 = vst [vmem:[%s1637_s17 + $0x90] sm:$0xff] %v393_v18  ;;  %396 = vst [vmem:[%s1637_s17 + $0x98] sm:$0xff] %v395_v19  ;;  %v399_v21 = vld [vmem:[%s1632_s16 + $0x150] sm:$0xff] }
  0x1b   : > { %398 = vst [vmem:[%s1637_s17 + $0xa0] sm:$0xff] %v397_v20  ;;  %v401_v22 = vld [vmem:[%s1632_s16 + $0x160] sm:$0xff]  ;;  %v403_v23 = vld [vmem:[%s1632_s16 + $0x170] sm:$0xff]  ;;  %400 = vst [vmem:[%s1637_s17 + $0xa8] sm:$0xff] %v399_v21 }
  0x1c   : > { %402 = vst [vmem:[%s1637_s17 + $0xb0] sm:$0xff] %v401_v22  ;;  %404 = vst [vmem:[%s1637_s17 + $0xb8] sm:$0xff] %v403_v23  ;;  %v405_v24 = vld [vmem:[%s1632_s16 + $0x180] sm:$0xff]  ;;  %v407_v25 = vld [vmem:[%s1632_s16 + $0x190] sm:$0xff] }
  0x1d   : > { %v409_v26 = vld [vmem:[%s1632_s16 + $0x1a0] sm:$0xff]  ;;  %406 = vst [vmem:[%s1637_s17 + $0xc0] sm:$0xff] %v405_v24  ;;  %408 = vst [vmem:[%s1637_s17 + $0xc8] sm:$0xff] %v407_v25  ;;  %v411_v27 = vld [vmem:[%s1632_s16 + $0x1b0] sm:$0xff] }
  0x1e   : > { %410 = vst [vmem:[%s1637_s17 + $0xd0] sm:$0xff] %v409_v26  ;;  %v413_v28 = vld [vmem:[%s1632_s16 + $0x1c0] sm:$0xff]  ;;  %v415_v29 = vld [vmem:[%s1632_s16 + $0x1d0] sm:$0xff]  ;;  %412 = vst [vmem:[%s1637_s17 + $0xd8] sm:$0xff] %v411_v27 }
  0x1f   : > { %414 = vst [vmem:[%s1637_s17 + $0xe0] sm:$0xff] %v413_v28  ;;  %416 = vst [vmem:[%s1637_s17 + $0xe8] sm:$0xff] %v415_v29  ;;  %v417_v30 = vld [vmem:[%s1632_s16 + $0x1e0] sm:$0xff]  ;;  %v419_v31 = vld [vmem:[%s1632_s16 + $0x1f0] sm:$0xff] }
  0x20   : > { %418 = vst [vmem:[%s1637_s17 + $0xf0] sm:$0xff] %v417_v30  ;;  %420 = vst [vmem:[%s1637_s17 + $0xf8] sm:$0xff] %v419_v31 }
  0x21 PF: > { %p1240_p6 = scmp.ge.s32.totalorder %s1542_s28, 1  ;;  %p443_p7 = scmp.lt.s32.totalorder %s1542_s28, 3 }
  0x23   : > { %p444_p8 = pnand %p1240_p6, %p443_p7 }
  0x24   : > { %s450_s18 = sand.u32 (!%p444_p8), 1, %s1526_s24   ;;  %s1242_s19 = sshll.u32 (!%p444_p8), %s1534_s26, 1 }
  0x25   : > { %447 = sbr.rel (%p444_p8) target bundleno = 875 (0x36b), region = 82  ;;  %s1241_s20 = sshll.u32 (!%p444_p8), %s450_s18, 8 }
  0x26   : > { %p501_p9 = scmp.lt.s32.totalorder (!%p444_p8), %s1242_s19, 3  ;;  %s1243_s21 = sshll.u32 (!%p444_p8), %s1534_s26, 5 }
  0x27   : > { %p506_p10 = scmp.lt.s32.totalorder (!%p444_p8), %s1243_s21, 63  ;;  %s1716_s24 = scalar_lea.vmem (!%p444_p8), [#allocation3], %s1241_s20 }
  0x28   : > { %p1246_p11 = scmp.ne.s32.totalorder (!%p444_p8), %s1534_s26, 0 }
  0x2a   : > { %s1882_s19 = smov (!%p501_p9, %s1242_s19), 3  ;;  %s1884_s21 = smov (!%p506_p10, %s1243_s21), 63 }
  0x2b   : > { %s503_s8 = scalar_lea.vmem %s1868_s2, %s1882_s19  ;;  %s1317_s9 = sshll.u32 %s1884_s21, 3 }
  0x2c   : > { %s1714_s13 = scalar_lea.vmem %s1869_s3, %s1317_s9  ;;  %516 = sbr.rel (%p1246_p11) target bundleno = 52 (0x34), region = 90 }
  0x31   : > { %v1544_v32 = vmov 0.0  }
  0x32   : > { %517 = vst [vmem:[#allocation2 + $0x10] sm:$0xff] %v1544_v32  ;;  %518 = vst [vmem:[#allocation2] sm:$0xff] %v1544_v32 }
  0x33   : > { %519 = vst [vmem:[#allocation2 + $0x18] sm:$0xff] %v1544_v32  ;;  %520 = vst [vmem:[#allocation2 + $0x8] sm:$0xff] %v1544_v32 }
  0x34 PF: > { %v1368_v33 = vld [vmem:[%s1716_s24 + $0x74] ss:$8 sps:$4 sm:$0xff]   ;;  %v1370_v34 = vld [vmem:[%s1716_s24 + $0x70] ss:$8 sps:$4 sm:$0xff]   ;;  %v1371_v35 = vld [vmem:[%s1716_s24 + $0x64] ss:$8 sps:$4 sm:$0xff]  }
  0x35   : > { %731 = vmatprep.subr.bf16.mxu0 %v1368_v33  ;;  %v1373_v36 = vld [vmem:[%s1716_s24 + $0x60] ss:$8 sps:$4 sm:$0xff]   ;;  %v1374_v37 = vld [vmem:[%s1716_s24 + $0x54] ss:$8 sps:$4 sm:$0xff]   ;;  %v1376_v38 = vld [vmem:[%s1716_s24 + $0x50] ss:$8 sps:$4 sm:$0xff]  }
  0x36   : > { %732 = vmatpush1.bf16.msra.mxu0 %v1370_v34  ;;  %v1377_v39 = vld [vmem:[%s1716_s24 + $0x44] ss:$8 sps:$4 sm:$0xff]   ;;  %v1379_v40 = vld [vmem:[%s1716_s24 + $0x40] ss:$8 sps:$4 sm:$0xff]   ;;  %v1380_v41 = vld [vmem:[%s1716_s24 + $0x34] ss:$8 sps:$4 sm:$0xff]  }
  0x37   : > { %733 = vmatprep.subr.bf16.mxu0 %v1371_v35  ;;  %v1382_v42 = vld [vmem:[%s1716_s24 + $0x30] ss:$8 sps:$4 sm:$0xff]   ;;  %v1383_v43 = vld [vmem:[%s1716_s24 + $0x24] ss:$8 sps:$4 sm:$0xff]   ;;  %v1385_v44 = vld [vmem:[%s1716_s24 + $0x20] ss:$8 sps:$4 sm:$0xff]  }
  0x38   : > { %v1386_v45 = vld [vmem:[%s1716_s24 + $0x14] ss:$8 sps:$4 sm:$0xff]   ;;  %v522_v46 = vld [vmem:[%s1866_s0 + $0x8] sm:$0xff]  ;;  %v1388_v48 = vld [vmem:[%s1716_s24 + $0x10] ss:$8 sps:$4 sm:$0xff]   ;;  %p1311_p12 = scmp.ne.s32.totalorder %s1534_s26, 1 }
  0x39   : > { %v524_v47 = vld [vmem:[%s1866_s0 + $0x18] sm:$0xff]  ;;  %v1389_v49 = vld [vmem:[%s1716_s24 + $0x4] ss:$8 sps:$4 sm:$0xff]   ;;  %v1421_v54 = vld [vmem:[%s1714_s13 + $0x60] ss:$8 sps:$4 sm:$0xff]  }
  0x3a   : > { %734 = vmatpush1.bf16.msra.mxu0 %v1373_v36  ;;  %v526_v50 = vpack.c.bf16 %v524_v47, %v522_v46  ;;  %v1416_v51 = vld [vmem:[%s1714_s13 + $0x74] ss:$8 sps:$4 sm:$0xff]   ;;  %v1418_v52 = vld [vmem:[%s1714_s13 + $0x70] ss:$8 sps:$4 sm:$0xff]   ;;  %v1419_v53 = vld [vmem:[%s1714_s13 + $0x64] ss:$8 sps:$4 sm:$0xff]  }
  0x3b   : > { %735 = vmatprep.subr.bf16.mxu0 %v1374_v37  ;;  %976 = vmatprep.subr.bf16.mxu1 %v1416_v51  ;;  %v1391_v55 = vld [vmem:[%s1716_s24] ss:$8 sps:$4 sm:$0xff]   ;;  %v1422_v56 = vld [vmem:[%s1714_s13 + $0x54] ss:$8 sps:$4 sm:$0xff]   ;;  %v1424_v58 = vld [vmem:[%s1714_s13 + $0x50] ss:$8 sps:$4 sm:$0xff]  }
  0x3c   : > { %763 = vmatprep.mubr.bf16.mxu0 %v526_v50  ;;  %977 = vmatpush1.bf16.msra.mxu1 %v1418_v52  ;;  %v1392_v57 = vld [vmem:[%s1716_s24 + $0xf4] ss:$8 sps:$4 sm:$0xff]   ;;  %v1394_v59 = vld [vmem:[%s1716_s24 + $0xf0] ss:$8 sps:$4 sm:$0xff]   ;;  %v1425_v60 = vld [vmem:[%s1714_s13 + $0x44] ss:$8 sps:$4 sm:$0xff]  }
  0x3d   : > { %978 = vmatprep.subr.bf16.mxu1 %v1419_v53  ;;  %v1395_v61 = vld [vmem:[%s1716_s24 + $0xe4] ss:$8 sps:$4 sm:$0xff]   ;;  %v1397_v62 = vld [vmem:[%s1716_s24 + $0xe0] ss:$8 sps:$4 sm:$0xff]   ;;  %v1398_v0 = vld [vmem:[%s1716_s24 + $0xd4] ss:$8 sps:$4 sm:$0xff]  }
  0x3e   : > { %736 = vmatpush1.bf16.msra.mxu0 %v1376_v38  ;;  %v1427_v63 = vld [vmem:[%s1714_s13 + $0x40] ss:$8 sps:$4 sm:$0xff]   ;;  %v1428_v1 = vld [vmem:[%s1714_s13 + $0x34] ss:$8 sps:$4 sm:$0xff]   ;;  %v1430_v2 = vld [vmem:[%s1714_s13 + $0x30] ss:$8 sps:$4 sm:$0xff]  }
  0x3f   : > { %737 = vmatprep.subr.bf16.mxu0 %v1377_v39  ;;  %v1400_v3 = vld [vmem:[%s1716_s24 + $0xd0] ss:$8 sps:$4 sm:$0xff]   ;;  %v1431_v4 = vld [vmem:[%s1714_s13 + $0x24] ss:$8 sps:$4 sm:$0xff]   ;;  %v1433_v6 = vld [vmem:[%s1714_s13 + $0x20] ss:$8 sps:$4 sm:$0xff]   ;;  %v561_v39 = vlaneseq }
  0x40   : > { %979 = vmatpush1.bf16.msra.mxu1 %v1421_v54  ;;  %v1401_v5 = vld [vmem:[%s1716_s24 + $0xc4] ss:$8 sps:$4 sm:$0xff]   ;;  %v1403_v7 = vld [vmem:[%s1716_s24 + $0xc0] ss:$8 sps:$4 sm:$0xff]   ;;  %v1434_v8 = vld [vmem:[%s1714_s13 + $0x14] ss:$8 sps:$4 sm:$0xff]  }
  0x41   : > { %980 = vmatprep.subr.bf16.mxu1 %v1422_v56  ;;  %v1404_v9 = vld [vmem:[%s1716_s24 + $0xb4] ss:$8 sps:$4 sm:$0xff]   ;;  %v1436_v10 = vld [vmem:[%s1714_s13 + $0x10] ss:$8 sps:$4 sm:$0xff]   ;;  %v1437_v12 = vld [vmem:[%s1714_s13 + $0x4] ss:$8 sps:$4 sm:$0xff]  }
  0x42   : > { %738 = vmatpush1.bf16.msra.mxu0 %v1379_v40  ;;  %v1406_v11 = vld [vmem:[%s1716_s24 + $0xb0] ss:$8 sps:$4 sm:$0xff]   ;;  %v1407_v13 = vld [vmem:[%s1716_s24 + $0xa4] ss:$8 sps:$4 sm:$0xff]   ;;  %v1439_v14 = vld [vmem:[%s1714_s13] ss:$8 sps:$4 sm:$0xff]  }
  0x43   : > { %739 = vmatprep.subr.bf16.mxu0 %v1380_v41  ;;  %v1409_v15 = vld [vmem:[%s1716_s24 + $0xa0] ss:$8 sps:$4 sm:$0xff]   ;;  %v1440_v16 = vld [vmem:[%s1714_s13 + $0xf4] ss:$8 sps:$4 sm:$0xff]   ;;  %v1442_v18 = vld [vmem:[%s1714_s13 + $0xf0] ss:$8 sps:$4 sm:$0xff]  }
  0x44   : > { %981 = vmatpush1.bf16.msra.mxu1 %v1424_v58  ;;  %v1410_v17 = vld [vmem:[%s1716_s24 + $0x94] ss:$8 sps:$4 sm:$0xff]   ;;  %v1412_v19 = vld [vmem:[%s1716_s24 + $0x90] ss:$8 sps:$4 sm:$0xff]   ;;  %v1443_v20 = vld [vmem:[%s1714_s13 + $0xe4] ss:$8 sps:$4 sm:$0xff]  }
  0x45   : > { %982 = vmatprep.subr.bf16.mxu1 %v1425_v60  ;;  %v1413_v21 = vld [vmem:[%s1716_s24 + $0x84] ss:$8 sps:$4 sm:$0xff]   ;;  %v1445_v22 = vld [vmem:[%s1714_s13 + $0xe0] ss:$8 sps:$4 sm:$0xff]   ;;  %v523_v25 = vld [vmem:[%s1866_s0 + $0x10] sm:$0xff]  ;;  %v562_v40 = vshrl.u32 %v561_v39, 7 }
  0x46   : > { %740 = vmatpush1.bf16.msra.mxu0 %v1382_v42  ;;  %v1415_v23 = vld [vmem:[%s1716_s24 + $0x80] ss:$8 sps:$4 sm:$0xff]   ;;  %v1446_v27 = vld [vmem:[%s1714_s13 + $0xd4] ss:$8 sps:$4 sm:$0xff]   ;;  %v1448_v28 = vld [vmem:[%s1714_s13 + $0xd0] ss:$8 sps:$4 sm:$0xff]  }
  0x47   : > { %741 = vmatprep.subr.bf16.mxu0 %v1383_v43  ;;  %v521_v24 = vld [vmem:[%s1866_s0] sm:$0xff]  ;;  %v1452_v31 = vld [vmem:[%s1714_s13 + $0xb4] ss:$8 sps:$4 sm:$0xff]   ;;  %v1454_v32 = vld [vmem:[%s1714_s13 + $0xb0] ss:$8 sps:$4 sm:$0xff]   ;;  %v1795_v41 = vsub.s32 1, %v562_v40 }
  0x48   : > { %983 = vmatpush1.bf16.msra.mxu1 %v1427_v63  ;;  %v525_v26 = vpack.c.bf16 %v523_v25, %v521_v24  ;;  %v1449_v29 = vld [vmem:[%s1714_s13 + $0xc4] ss:$8 sps:$4 sm:$0xff]   ;;  %v1451_v30 = vld [vmem:[%s1714_s13 + $0xc0] ss:$8 sps:$4 sm:$0xff]   ;;  %v1458_v35 = vld [vmem:[%s1714_s13 + $0x94] ss:$8 sps:$4 sm:$0xff]  }
  0x49   : > { %984 = vmatprep.subr.bf16.mxu1 %v1428_v1  ;;  %v1455_v33 = vld [vmem:[%s1714_s13 + $0xa4] ss:$8 sps:$4 sm:$0xff]   ;;  %v1457_v34 = vld [vmem:[%s1714_s13 + $0xa0] ss:$8 sps:$4 sm:$0xff]   ;;  %v1460_v36 = vld [vmem:[%s1714_s13 + $0x90] ss:$8 sps:$4 sm:$0xff]  }
  0x4a   : > { %742 = vmatpush1.bf16.msra.mxu0 %v1385_v44  ;;  %v1461_v37 = vld [vmem:[%s1714_s13 + $0x84] ss:$8 sps:$4 sm:$0xff]   ;;  %v1463_v38 = vld [vmem:[%s1714_s13 + $0x80] ss:$8 sps:$4 sm:$0xff]   ;;  %v1802_v43 = vsub.s32 0, %v562_v40  ;;  %v778_v60 = vld [vmem:[#allocation2 + $0x10] sm:$0xff] }
  0x4b   : > { %743 = vmatprep.subr.bf16.mxu0 %v1386_v45  ;;  %v559_v42 = vld [vmem:[%s503_s8] sm:$0x3]  ;;  %v780_v1 = vld [vmem:[#allocation2 + $0x18] sm:$0xff] }
  0x4c   : > { %985 = vmatpush1.bf16.msra.mxu1 %v1430_v2  ;;  %v568_v44 = vrot.slane %v559_v42, %v1795_v41  ;;  %v564_v46 = vrot.slane %v559_v42, %v1802_v43 }
  0x4d   : > { %986 = vmatprep.subr.bf16.mxu1 %v1431_v4  ;;  %v781_v4 = vld [vmem:[#allocation2 + $0x8] sm:$0xff] }
  0x4e   : > { %744 = vmatpush1.bf16.msra.mxu0 %v1388_v48 }
  0x4f   : > { %745 = vmatprep.subr.bf16.mxu0 %v1389_v49 }
  0x50   : > { %987 = vmatpush1.bf16.msra.mxu1 %v1433_v6 }
  0x51   : > { %988 = vmatprep.subr.bf16.mxu1 %v1434_v8 }
  0x52   : > { %746 = vmatpush1.bf16.msra.mxu0 %v1391_v55 }
  0x53   : > { %747 = vmatprep.subr.bf16.mxu0 %v1392_v57 }
  0x54   : > { %989 = vmatpush1.bf16.msra.mxu1 %v1436_v10 }
  0x55   : > { %990 = vmatprep.subr.bf16.mxu1 %v1437_v12 }
  0x56   : > { %748 = vmatpush2.bf16.msra.mxu0 %v1394_v59 }
  0x57   : > { %749 = vmatprep.subr.bf16.mxu0 %v1395_v61 }
  0x58   : > { %991 = vmatpush1.bf16.msra.mxu1 %v1439_v14 }
  0x59   : > { %992 = vmatprep.subr.bf16.mxu1 %v1440_v16 }
  0x5a   : > { %750 = vmatpush2.bf16.msra.mxu0 %v1397_v62  ;;  %v779_v62 = vld [vmem:[#allocation2] sm:$0xff] }
  0x5b   : > { %751 = vmatprep.subr.bf16.mxu0 %v1398_v0 }
  0x5c   : > { %993 = vmatpush2.bf16.msra.mxu1 %v1442_v18 }
  0x5d   : > { %994 = vmatprep.subr.bf16.mxu1 %v1443_v20 }
  0x5e   : > { %752 = vmatpush2.bf16.msra.mxu0 %v1400_v3 }
  0x5f   : > { %753 = vmatprep.subr.bf16.mxu0 %v1401_v5 }
  0x60   : > { %995 = vmatpush2.bf16.msra.mxu1 %v1445_v22 }
  0x61   : > { %996 = vmatprep.subr.bf16.mxu1 %v1446_v27 }
  0x62   : > { %754 = vmatpush2.bf16.msra.mxu0 %v1403_v7 }
  0x63   : > { %755 = vmatprep.subr.bf16.mxu0 %v1404_v9 }
  0x64   : > { %997 = vmatpush2.bf16.msra.mxu1 %v1448_v28 }
  0x65   : > { %998 = vmatprep.subr.bf16.mxu1 %v1449_v29 }
  0x66   : > { %756 = vmatpush2.bf16.msra.mxu0 %v1406_v11 }
  0x67   : > { %757 = vmatprep.subr.bf16.mxu0 %v1407_v13 }
  0x68   : > { %999 = vmatpush2.bf16.msra.mxu1 %v1451_v30 }
  0x69   : > { %1000 = vmatprep.subr.bf16.mxu1 %v1452_v31 }
  0x6a   : > { %758 = vmatpush2.bf16.msra.mxu0 %v1409_v15 }
  0x6b   : > { %759 = vmatprep.subr.bf16.mxu0 %v1410_v17 }
  0x6c   : > { %1001 = vmatpush2.bf16.msra.mxu1 %v1454_v32 }
  0x6d   : > { %1002 = vmatprep.subr.bf16.mxu1 %v1455_v33 }
  0x6e   : > { %760 = vmatpush2.bf16.msra.mxu0 %v1412_v19 }
  0x6f   : > { %761 = vmatprep.subr.bf16.mxu0 %v1413_v21 }
  0x70   : > { %1003 = vmatpush2.bf16.msra.mxu1 %v1457_v34 }
  0x71   : > { %1004 = vmatprep.subr.bf16.mxu1 %v1458_v35 }
  0x72   : > { %762 = vmatpush2.bf16.msra.mxu0 %v1415_v23 }
  0x74   : > { %1005 = vmatpush2.bf16.msra.mxu1 %v1460_v36 }
  0x75   : > { %764 = vmatmul.mubr.bf16.vlgmr.msra.gmra.mxu0 %v525_v26  ;;  %1006 = vmatprep.subr.bf16.mxu1 %v1461_v37 }
  0x78   : > { %1007 = vmatpush2.bf16.msra.mxu1 %v1463_v38 }
 0x135   : > { %v765_v45 = vpop.f32.mrf.mxu0 }
 0x136   : > { %v766_v51 = vadd.f32 %v765_v45, %v564_v46 }
 0x137   : > { %v767_v47 = vpop.f32.mrf.mxu0 }
 0x138   : > { %v768_v48 = vadd.f32 %v767_v47, %v568_v44 }
 0x139   : > { %v769_v49 = vpop.f32.mrf.mxu0 }
 0x13a   : > { %v770_v50 = vadd.f32 %v769_v49, %v564_v46  ;;  %1464 = vtanh.f32 %v768_v48 }
 0x13b   : > { %v771_v52 = vpop.f32.mrf.mxu0 }
 0x13c   : > { %v772_v53 = vadd.f32 %v771_v52, %v568_v44  ;;  %1466 = vtanh.f32 %v770_v50 }
 0x13e   : > { %1468 = vtanh.f32 %v772_v53 }
 0x13f   : > { %1470 = vtanh.f32 %v766_v51 }
 0x147   : > { %v1465_v54 = vpop.eup %1464 }
 0x149   : > { %v1467_v55 = vpop.eup %1466 }
 0x14b   : > { %v1469_v56 = vpop.eup %1468 }
 0x14c   : > { %v1471_v57 = vpop.eup %1470  ;;  %v783_v58 = vpack.c.bf16 %v1469_v56, %v1465_v54 }
 0x14d   : > { %v782_v59 = vpack.c.bf16 %v1467_v55, %v1471_v57 }
 0x14e   : > { %1008 = vmatprep.mubr.bf16.mxu1 %v783_v58 }
 0x14f   : > { %1009 = vmatmul.mubr.bf16.vlgmr.msra.gmra.mxu1 %v782_v59 }
 0x20f   : > { %v1010_v61 = vpop.f32.mrf.mxu1 }
 0x210   : > { %v1019_v63 = vadd.f32 %v1010_v61, %v778_v60 }
 0x211   : > { %v1012_v0 = vpop.f32.mrf.mxu1 }
 0x212   : > { %1023 = vst [vmem:[#allocation2 + $0x10] sm:$0xff] %v1019_v63  ;;  %v1020_v2 = vadd.f32 %v1012_v0, %v779_v62 }
 0x213   : > { %v1014_v3 = vpop.f32.mrf.mxu1 }
 0x214   : > { %1024 = vst [vmem:[#allocation2] sm:$0xff] %v1020_v2  ;;  %v1021_v5 = vadd.f32 %v1014_v3, %v780_v1  ;;  %1030 = sbr.rel (%p1311_p12) target bundleno = 859 (0x35b), region = 94 }
 0x215   : > { %v1016_v6 = vpop.f32.mrf.mxu1 }
 0x216   : > { %1025 = vst [vmem:[#allocation2 + $0x18] sm:$0xff] %v1021_v5  ;;  %v1022_v7 = vadd.f32 %v1016_v6, %v781_v4 }
 0x218   : > { %1026 = vst [vmem:[#allocation2 + $0x8] sm:$0xff] %v1022_v7 }
 0x219   : > { %v1031_v8 = vld [vmem:[%s1866_s0] sm:$0xff]  ;;  %v1032_v9 = vld [vmem:[%s1866_s0 + $0x8] sm:$0xff]  ;;  %v1035_v10 = vld [vmem:[#allocation2 + $0x10] sm:$0xff] }
 0x21a   : > { %v1039_v12 = vadd.f32 %v1035_v10, %v1031_v8  ;;  %v1043_v13 = vld [vmem:[%s1870_s4] sm:$0x3]  ;;  %v1033_v14 = vld [vmem:[%s1866_s0 + $0x10] sm:$0xff]  ;;  %v1034_v18 = vld [vmem:[%s1866_s0 + $0x18] sm:$0xff] }
 0x21b   : > { %v1036_v11 = vld [vmem:[#allocation2] sm:$0xff]  ;;  %v1048_v16 = vrot.slane %v1043_v13, %v1802_v43  ;;  %v1052_v17 = vrot.slane %v1043_v13, %v1795_v41 }
 0x21c   : > { %v1040_v15 = vadd.f32 %v1036_v11, %v1032_v9  ;;  %v1092_v51 = vld [vmem:[%s1871_s5] sm:$0x3] }
 0x21d   : > { %v1037_v19 = vld [vmem:[#allocation2 + $0x18] sm:$0xff]  ;;  %v1055_v23 = vadd.f32 %v1048_v16, %v1039_v12  ;;  %v1108_v52 = vld [vmem:[%s1872_s6] sm:$0x3]  ;;  %v1097_v53 = vrot.slane %v1092_v51, %v1802_v43  ;;  %v1101_v54 = vrot.slane %v1092_v51, %v1795_v41 }
 0x21e   : > { %v1041_v21 = vadd.f32 %v1037_v19, %v1033_v14  ;;  %v1056_v24 = vadd.f32 %v1052_v17, %v1040_v15  ;;  %v1113_v56 = vrot.slane %v1108_v52, %v1802_v43  ;;  %v1117_v57 = vrot.slane %v1108_v52, %v1795_v41 }
 0x21f   : > { %v1038_v20 = vld [vmem:[#allocation2 + $0x8] sm:$0xff] }
 0x220   : > { %v1042_v22 = vadd.f32 %v1038_v20, %v1034_v18  ;;  %v1057_v25 = vadd.f32 %v1048_v16, %v1041_v21  ;;  %v1059_v27 = vadd.f32 %v1056_v24, %v1055_v23 }
 0x222   : > { %v1058_v26 = vadd.f32 %v1052_v17, %v1042_v22  ;;  %1060 = vadd.xlane.f32.xlu0 %v1059_v27 }
 0x224   : > { %v1062_v28 = vadd.f32 %v1058_v26, %v1057_v25 }
 0x226   : > { %1063 = vadd.xlane.f32.xlu0 %v1062_v28 }
 0x2ab   : > { %v1061_v29 = vpop.xlane.xlu0 %1060 }
 0x2ac   : > { %v1066_v30 = vmul.f32 0.00390625, %v1061_v29 }
 0x2ae   : > { %v1068_v31 = vsub.f32 %v1055_v23, %v1066_v30  ;;  %v1069_v32 = vsub.f32 %v1056_v24, %v1066_v30 }
 0x2af   : > { %v1064_v33 = vpop.xlane.xlu0 %1063 }
 0x2b0   : > { %v1067_v34 = vmul.f32 0.00390625, %v1064_v33  ;;  %v1072_v35 = vmul.f32 %v1068_v31, %v1068_v31  ;;  %v1073_v36 = vmul.f32 %v1069_v32, %v1069_v32 }
 0x2b2   : > { %v1070_v37 = vsub.f32 %v1057_v25, %v1067_v34  ;;  %v1071_v38 = vsub.f32 %v1058_v26, %v1067_v34  ;;  %v1076_v39 = vadd.f32 %v1073_v36, %v1072_v35 }
 0x2b4   : > { %1077 = vadd.xlane.f32.xlu1 %v1076_v39  ;;  %v1074_v40 = vmul.f32 %v1070_v37, %v1070_v37  ;;  %v1075_v42 = vmul.f32 %v1071_v38, %v1071_v38 }
 0x2b6   : > { %v1079_v44 = vadd.f32 %v1075_v42, %v1074_v40 }
 0x2b8   : > { %1080 = vadd.xlane.f32.xlu1 %v1079_v44 }
 0x33d   : > { %v1078_v45 = vpop.xlane.xlu1 %1077 }
 0x33e   : > { %v1082_v46 = vmul.f32 0.00390625, %v1078_v45 }
 0x340   : > { %v1084_v47 = vadd.f32 1e-05, %v1082_v46 }
 0x341   : > { %v1081_v48 = vpop.xlane.xlu1 %1080 }
 0x342   : > { %1472 = vrsqrt.f32 %v1084_v47  ;;  %v1083_v49 = vmul.f32 0.00390625, %v1081_v48 }
 0x344   : > { %v1085_v50 = vadd.f32 1e-05, %v1083_v49 }
 0x346   : > { %1474 = vrsqrt.f32 %v1085_v50 }
 0x34f   : > { %v1473_v55 = vpop.eup %1472 }
 0x350   : > { %v1088_v58 = vmul.f32 %v1473_v55, %v1068_v31  ;;  %v1089_v59 = vmul.f32 %v1473_v55, %v1069_v32 }
 0x352   : > { %v1104_v60 = vmul.f32 %v1097_v53, %v1088_v58  ;;  %v1105_v61 = vmul.f32 %v1101_v54, %v1089_v59 }
 0x353   : > { %v1475_v62 = vpop.eup %1474 }
 0x354   : > { %v1120_v63 = vadd.f32 %v1113_v56, %v1104_v60  ;;  %v1121_v0 = vadd.f32 %v1117_v57, %v1105_v61  ;;  %v1090_v1 = vmul.f32 %v1475_v62, %v1070_v37  ;;  %v1091_v2 = vmul.f32 %v1475_v62, %v1071_v38 }
 0x356   : > { %1124 = vst [vmem:[#allocation4] sm:$0xff] %v1120_v63  ;;  %1125 = vst [vmem:[#allocation4 + $0x8] sm:$0xff] %v1121_v0  ;;  %v1106_v3 = vmul.f32 %v1097_v53, %v1090_v1  ;;  %v1107_v4 = vmul.f32 %v1101_v54, %v1091_v2 }
 0x358   : > { %v1122_v5 = vadd.f32 %v1113_v56, %v1106_v3  ;;  %v1123_v6 = vadd.f32 %v1117_v57, %v1107_v4 }
 0x35a   : > { %1126 = vst [vmem:[#allocation4 + $0x10] sm:$0xff] %v1122_v5  ;;  %1127 = vst [vmem:[#allocation4 + $0x18] sm:$0xff] %v1123_v6 }
 0x35b PF: > { %p1836_p13 = scmp.eq.s32.totalorder %s1233_s29, 1  ;;  %s1545_s23 = smov [#allocation4]  }
 0x35c   : > { %s1138_s9 = sshll.u32 %s1545_s23, 4  ;;  %s1139_s9 = int_to_ptr.vmem [resolvable:$true] %s1138_s9 }
 0x35d   : > { %s1476_s19 = scalar_lea.vmem %s1139_s9, 512  ;;  %p1483_p3 = scmp.lt.s32.totalorder %s1139_s9, %s1139_s9 }
 0x35e   : > { %p1477_p0 = scmp.ne.s32.totalorder %s1139_s9, %s1476_s19  ;;  %p1484_p4 = scmp.lt.s32.totalorder %s1476_s19, %s1476_s19 }
 0x360   : > { %p1478_p1 = pnand %p1477_p0, %p1836_p13  ;;  %p1485_p5 = por %p1484_p4, %p1483_p3 }
 0x362   : > { %p1479_p2 = pneg %p1478_p1 }
 0x364   : > { %p1486_p6 = pnand %p1485_p5, %p1479_p2 }
 0x366   : > { %1489 = shalt.err (!%p1486_p6)
}
 0x367   : > { %s1546_s8 = smov 256   ;;  %s1547_s29 = smov 16  }
 0x368   : > { %1319 = dma.vmem_to_hbm [thread:$0]  (%p1836_p13), %s1139_s9, 512, %s1873_s7, [#allocation5], %s1546_s8, %s1546_s8, %s1547_s29  }
 0x369   : > { %1521 = dma.done.wait (%p1836_p13), [#allocation5], 512  }
 0x36a   : > { %1523 = vsyncadd (%p1836_p13), [#allocation5], 4294966784 }
 0x36b PF: > { %s18_s28 = sadd.s32 1, %s1542_s28   ;;  %s1875_s24 = smov %s1530_s25 }
 0x36c   : > { %p15_p7 = scmp.ge.s32.totalorder %s18_s28, 4   ;;  %s1876_s25 = smov %s1624_s10 }
 0x36d   : > { %s1877_s26 = smov %s1538_s27  ;;  %s1878_s27 = smov %s1880_s30 }
 0x36e   :  { %17 = sbr.rel (!%p15_p7) target bundleno = 3 (0x3), region = 136 }
 0x373   :  { %1154 = vsyncpa [#allocation5], 1 }
 0x374   :  { %1156 = vsyncpa [#allocation5 + $0x1], 1 }

</bundles_post_ra>
